<compile_context>
chip_gen: v5e
topology: v5e:2x2
jax: 0.10.0
libtpu: 0.0.40
codegen_flags: <defaults>
</compile_context>

<pallas_src>
import functools
import math

import jax
import jax.numpy as jnp
from jax.experimental import pallas as pl
from jax.experimental.pallas import tpu as pltpu


def _round_up(n, m):
    return (n + m - 1) // m * m


# -----------------------------------------------------------------------------
# Kernel A: token GEMM with bias (used for the fused QKV projection and out_proj)
# -----------------------------------------------------------------------------
def _gemm_bias_kernel(x_ref, w_ref, b_ref, o_ref, *, matmul_dtype):
    x = x_ref[...].astype(matmul_dtype)              # (rt, K) matmul operands (bf16 default)
    w = w_ref[...].astype(matmul_dtype)              # (K, F)  resident weights
    acc = jnp.dot(x, w, preferred_element_type=jnp.float32)   # f32 accumulation on the MXU
    o_ref[...] = (acc + b_ref[...]).astype(o_ref.dtype)       # bias add in f32


def _gemm_bias(x, w, b, *, row_tile, matmul_dtype, single_buffer_weights):
    """y = x @ w + b.   x: (N, K), w: (K, F), b: (1, F)  ->  (N, F) float32."""
    N, K = x.shape
    F = w.shape[1]

    # Large row tiles; pad the token count to a tile multiple instead of asserting.
    rt = min(row_tile, _round_up(N, 8))
    n_pad = _round_up(N, rt)
    if n_pad != N:
        x = jnp.pad(x, ((0, n_pad - N), (0, 0)))
    grid = (n_pad // rt,)

    # Constant-index weights/bias: single-buffer them to halve their VMEM footprint.
    # TODO(synk): for very large D the K/F axes would also need grid tiling (esp. v7x 64 MiB).
    if single_buffer_weights:
        w_spec = pl.BlockSpec((K, F), lambda i: (0, 0), pipeline_mode=pl.Buffered(1))
        b_spec = pl.BlockSpec((1, F), lambda i: (0, 0), pipeline_mode=pl.Buffered(1))
    else:
        w_spec = pl.BlockSpec((K, F), lambda i: (0, 0))
        b_spec = pl.BlockSpec((1, F), lambda i: (0, 0))

    in_bytes = jnp.dtype(matmul_dtype).itemsize
    w_bufs = 1 if single_buffer_weights else 2
    vmem_bytes = (2 * rt * K * in_bytes                   # x tiles (double buffered)
                  + w_bufs * (K * F * in_bytes + F * 4)   # weights + bias
                  + 2 * rt * F * 4)                       # f32 output tiles (double buffered)
    vmem_limit = min(max(2 * vmem_bytes + (4 << 20), 32 << 20), 96 << 20)

    cost = pl.CostEstimate(
        flops=2 * n_pad * K * F,
        transcendentals=0,
        bytes_accessed=n_pad * K * in_bytes + K * F * in_bytes + n_pad * F * 4,
    )

    out = pl.pallas_call(
        functools.partial(_gemm_bias_kernel, matmul_dtype=matmul_dtype),
        out_shape=jax.ShapeDtypeStruct((n_pad, F), jnp.float32),
        grid_spec=pltpu.PrefetchScalarGridSpec(
            num_scalar_prefetch=0,
            grid=grid,
            in_specs=[pl.BlockSpec((rt, K), lambda i: (i, 0)), w_spec, b_spec],
            out_specs=pl.BlockSpec((rt, F), lambda i: (i, 0)),
        ),
        compiler_params=pltpu.CompilerParams(
            dimension_semantics=("parallel",),
            vmem_limit_bytes=vmem_limit,
        ),
        cost_estimate=cost,
    )(x, w, b)
    return out[:N]


# -----------------------------------------------------------------------------
# Kernel B: tied-row attention core, one (batch, head) pair per grid step
# -----------------------------------------------------------------------------
def _tied_row_attention_kernel(q_ref, k_ref, v_ref, o_ref, *, scaling, matmul_dtype):
    """q/k/v blocks are (1, C, R*Dh): attention over columns, logits summed over rows+head_dim."""
    q = q_ref[0].astype(matmul_dtype)                 # (C, R*Dh)
    k = k_ref[0].astype(matmul_dtype)
    # logits[i, j] = sum_{r,d} q[i, (r,d)] * k[j, (r,d)]   (MXU, f32 accumulate)
    logits = jax.lax.dot_general(
        q, k, dimension_numbers=(((1,), (1,)), ((), ())),
        preferred_element_type=jnp.float32)
    logits = logits * scaling
    # numerically-stable softmax over columns j (kept in f32)
    m = jnp.max(logits, axis=-1, keepdims=True)
    e = jnp.exp(logits - m)
    probs = e / jnp.sum(e, axis=-1, keepdims=True)
    # TODO(synk): training-mode dropout on attn probs not implemented (eval semantics only).
    # context[i, (r,d)] = sum_j probs[i, j] * v[j, (r,d)]
    ctx = jnp.dot(probs.astype(matmul_dtype), v_ref[0].astype(matmul_dtype),
                  preferred_element_type=jnp.float32)
    o_ref[0] = ctx.astype(o_ref.dtype)


def _tied_row_attention(q_r, k_r, v_r, *, scaling, matmul_dtype):
    """q_r/k_r/v_r: (B*H, C, R*Dh) in matmul dtype  ->  context (B*H, C, R*Dh) float32."""
    G, C, RD = q_r.shape
    in_bytes = jnp.dtype(matmul_dtype).itemsize
    vmem_bytes = (3 * 2 * C * RD * in_bytes      # q/k/v blocks (double buffered)
                  + 2 * C * RD * 4               # f32 context blocks
                  + 4 * C * C * 4)               # logits / probs intermediates
    vmem_limit = min(max(2 * vmem_bytes + (4 << 20), 32 << 20), 96 << 20)

    cost = pl.CostEstimate(
        flops=4 * G * C * C * RD,                # QK^T + PV
        transcendentals=G * C * C,               # exp
        bytes_accessed=3 * G * C * RD * in_bytes + G * C * RD * 4,
    )
    # TODO(synk): for very long sequences a flash-style tiling over C / row-chunks is needed;
    # this version keeps one (C, R*Dh) head-slab resident per grid step.
    blk = lambda: pl.BlockSpec((1, C, RD), lambda i: (i, 0, 0))

    return pl.pallas_call(
        functools.partial(_tied_row_attention_kernel, scaling=scaling,
                          matmul_dtype=matmul_dtype),
        out_shape=jax.ShapeDtypeStruct((G, C, RD), jnp.float32),
        grid_spec=pltpu.PrefetchScalarGridSpec(
            num_scalar_prefetch=0,
            grid=(G,),
            in_specs=[blk(), blk(), blk()],
            out_specs=blk(),
        ),
        compiler_params=pltpu.CompilerParams(
            dimension_semantics=("parallel",),
            vmem_limit_bytes=vmem_limit,
        ),
        cost_estimate=cost,
    )(q_r, k_r, v_r)


# -----------------------------------------------------------------------------
# Full forward
# -----------------------------------------------------------------------------
@functools.partial(
    jax.jit,
    static_argnames=("num_heads", "dim", "use_scaling", "row_tile", "matmul_dtype",
                     "single_buffer_weights"))
def _forward(x, wq, bq, wk, bk, wv, bv, wo, bo, *, num_heads, dim, use_scaling,
             row_tile, matmul_dtype, single_buffer_weights):
    if dim == 1:
        x = jnp.transpose(x, (1, 0, 2, 3))
    R, C, B, D = x.shape
    H = num_heads
    assert D % H == 0
    Dh = D // H
    md = matmul_dtype

    scaling = (Dh ** -0.5) / math.sqrt(R) if use_scaling else 1.0

    # --- fused QKV projection over all R*C*B tokens (token = (b, r, c)) ------
    xt = jnp.transpose(x, (2, 0, 1, 3)).reshape(B * R * C, D)
    w_qkv = jnp.concatenate([wq.T, wk.T, wv.T], axis=1).astype(md)       # (D, 3D)
    b_qkv = jnp.concatenate([bq, bk, bv]).reshape(1, 3 * D).astype(jnp.float32)
    qkv = _gemm_bias(xt.astype(md), w_qkv, b_qkv, row_tile=row_tile,
                     matmul_dtype=md, single_buffer_weights=single_buffer_weights)

    # --- rearrange to per-(batch, head) slabs of shape (C, R*Dh) -------------
    def to_heads(t):                       # (N, D) f32 -> (B*H, C, R*Dh) in matmul dtype
        t = t.reshape(B, R, C, H, Dh).transpose(0, 3, 2, 1, 4)
        return t.reshape(B * H, C, R * Dh).astype(md)

    q_r = to_heads(qkv[:, :D])
    k_r = to_heads(qkv[:, D:2 * D])
    v_r = to_heads(qkv[:, 2 * D:])

    ctx = _tied_row_attention(q_r, k_r, v_r, scaling=scaling, matmul_dtype=md)

    # --- back to token layout, output projection -----------------------------
    ctx_tok = (ctx.reshape(B, H, C, R, Dh).transpose(0, 3, 2, 1, 4)
               .reshape(B * R * C, D).astype(md))
    out = _gemm_bias(ctx_tok, wo.T.astype(md), bo.reshape(1, D).astype(jnp.float32),
                     row_tile=row_tile, matmul_dtype=md,
                     single_buffer_weights=single_buffer_weights)

    out = out.reshape(B, R, C, D).transpose(1, 2, 0, 3)     # (R, C, B, D)
    if dim == 1:
        out = jnp.transpose(out, (1, 0, 2, 3))
    return out


def self_attention_2d(x, wq, bq, wk, bk, wv, bv, wo, bo, *, num_heads, dim=0,
                      use_scaling=False, row_tile=256, matmul_dtype=jnp.bfloat16):
    """Eval-mode SelfAttention2D forward. x: (R, C, B, D) float32; weights in PyTorch
    Linear convention (out, in)."""
    # TODO(synk): padding_mask and RotaryEmbedding (use_rope=True) are not implemented;
    # defaults of the module (no mask, no rope, eval-mode dropout) are covered.
    kwargs = dict(num_heads=num_heads, dim=dim, use_scaling=use_scaling,
                  row_tile=row_tile, matmul_dtype=matmul_dtype)
    try:
        return _forward(x, wq, bq, wk, bk, wv, bv, wo, bo,
                        single_buffer_weights=True, **kwargs)
    except Exception:
        # Fallback if this JAX build rejects pl.Buffered(1) single-buffering of the
        # constant weight operands.
        return _forward(x, wq, bq, wk, bk, wv, bv, wo, bo,
                        single_buffer_weights=False, **kwargs)


# -----------------------------------------------------------------------------
# Pure-JAX reference (matmul_dtype lets us mirror the kernel's bf16-operand /
# f32-accumulate recipe exactly; float32 gives the true module semantics)
# -----------------------------------------------------------------------------
def _reference(x, wq, bq, wk, bk, wv, bv, wo, bo, *, num_heads, use_scaling,
               matmul_dtype=jnp.float32):
    R, C, B, D = x.shape
    H = num_heads
    Dh = D // H
    md = matmul_dtype
    hi = jax.lax.Precision.HIGHEST

    def lin(t, w, b):
        return jnp.dot(t.astype(md), w.T.astype(md),
                       preferred_element_type=jnp.float32, precision=hi) + b

    q = lin(x, wq, bq).reshape(R, C, B, H, Dh)
    k = lin(x, wk, bk).reshape(R, C, B, H, Dh)
    v = lin(x, wv, bv).reshape(R, C, B, H, Dh)
    scaling = (Dh ** -0.5) / math.sqrt(R) if use_scaling else 1.0
    logits = jnp.einsum('rinhd,rjnhd->hnij', q.astype(md), k.astype(md),
                        preferred_element_type=jnp.float32, precision=hi) * scaling
    probs = jax.nn.softmax(logits, axis=-1)
    ctx = jnp.einsum('hnij,rjnhd->rinhd', probs.astype(md), v.astype(md),
                     preferred_element_type=jnp.float32, precision=hi)
    ctx = ctx.reshape(R, C, B, D)
    return lin(ctx, wo, bo)


if __name__ == "__main__":
    # Small shapes consistent with the module: rows=8, cols=16, batch=2, embed=32, heads=4.
    R, C, B, D, H = 8, 16, 2, 32, 4
    key = jax.random.PRNGKey(0)
    kx, kq, kk, kv, ko = jax.random.split(key, 5)

    x = jax.random.normal(kx, (R, C, B, D), dtype=jnp.float32)

    def linear_params(k, fan_in, fan_out):
        kw, kb = jax.random.split(k)
        w = (jax.random.normal(kw, (fan_out, fan_in)) / jnp.sqrt(fan_in)).astype(jnp.float32)
        b = (0.02 * jax.random.normal(kb, (fan_out,))).astype(jnp.float32)
        return w, b

    wq, bq = linear_params(kq, D, D)
    wk, bk = linear_params(kk, D, D)
    wv, bv = linear_params(kv, D, D)
    wo, bo = linear_params(ko, D, D)

    # Default (bf16 MXU operands, f32 accumulation) path.
    out = self_attention_2d(x, wq, bq, wk, bk, wv, bv, wo, bo, num_heads=H)
    out = jax.block_until_ready(out)
    assert out.shape == (R, C, B, D)

    ref_bf16 = _reference(x, wq, bq, wk, bk, wv, bv, wo, bo, num_heads=H,
                          use_scaling=False, matmul_dtype=jnp.bfloat16)
    assert jnp.allclose(out, ref_bf16, atol=1e-2, rtol=1e-2), \
        "mismatch vs bf16-recipe reference"

    # Full-f32 path vs exact f32 reference (validates the module semantics tightly).
    out_f32 = self_attention_2d(x, wq, bq, wk, bk, wv, bv, wo, bo, num_heads=H,
                                matmul_dtype=jnp.float32)
    out_f32 = jax.block_until_ready(out_f32)
    ref_f32 = _reference(x, wq, bq, wk, bk, wv, bv, wo, bo, num_heads=H,
                         use_scaling=False, matmul_dtype=jnp.float32)
    assert jnp.allclose(out_f32, ref_f32, atol=5e-3, rtol=5e-3), \
        "mismatch vs f32 reference"

    print("KERNEL_OK")
</pallas_src>

<mosaic_0001>
module attributes {stable_mosaic.version = 11 : i64} {
  func.func @_gemm_bias_kernel(%arg0: i32, %arg1: memref<256x32xbf16, #tpu.memory_space<vmem>>, %arg2: memref<32x96xbf16, #tpu.memory_space<vmem>>, %arg3: memref<1x96xf32, #tpu.memory_space<vmem>>, %arg4: memref<256x96xf32, #tpu.memory_space<vmem>>) attributes {dimension_semantics = [#tpu.dimension_semantics<parallel>], iteration_bounds = array<i64: 1>, scalar_prefetch = 0 : i64, scratch_operands = 0 : i64, tpu.core_type = #tpu.core_type<tc>, window_params = [{transform_indices = @transform_0, window_bounds = array<i64: 256, 32>}, {pipeline_mode = #tpu.pipeline_mode<synchronous>, transform_indices = @transform_1, window_bounds = array<i64: 32, 96>}, {pipeline_mode = #tpu.pipeline_mode<synchronous>, transform_indices = @transform_2, window_bounds = array<i64: 1, 96>}, {transform_indices = @transform_3, window_bounds = array<i64: 256, 96>}]} {
    %c0 = arith.constant 0 : index
    %c0_0 = arith.constant 0 : index
    %0 = vector.load %arg1[%c0, %c0_0] : memref<256x32xbf16, #tpu.memory_space<vmem>>, vector<256x32xbf16>
    %c0_1 = arith.constant 0 : index
    %c0_2 = arith.constant 0 : index
    %1 = vector.load %arg2[%c0_1, %c0_2] : memref<32x96xbf16, #tpu.memory_space<vmem>>, vector<32x96xbf16>
    %cst = arith.constant dense<0.000000e+00> : vector<256x96xf32>
    %2 = tpu.matmul %0, %1, %cst {dimension_numbers = #tpu.dot_dimension_numbers<[1], [0], [0], [1], [0, 0, 1, 1], [], []>} : vector<256x32xbf16>, vector<32x96xbf16>, vector<256x96xf32> -> vector<256x96xf32>
    %c0_3 = arith.constant 0 : index
    %c0_4 = arith.constant 0 : index
    %3 = vector.load %arg3[%c0_3, %c0_4] : memref<1x96xf32, #tpu.memory_space<vmem>>, vector<1x96xf32>
    %4 = vector.broadcast %3 : vector<1x96xf32> to vector<256x96xf32>
    %5 = arith.addf %2, %4 : vector<256x96xf32>
    %c0_5 = arith.constant 0 : index
    %c0_6 = arith.constant 0 : index
    %6 = vector.load %arg4[%c0_5, %c0_6] : memref<256x96xf32, #tpu.memory_space<vmem>>, vector<256x96xf32>
    tpu.vector_store %arg4[%c0_5, %c0_6], %5 {strides = array<i32>} : memref<256x96xf32, #tpu.memory_space<vmem>>, vector<256x96xf32>,
    return
  }
  func.func @transform_0(%arg0: i32) -> (i32, i32) {
    %c0_i32 = arith.constant 0 : i32
    %c0_i32_0 = arith.constant 0 : i32
    return %arg0, %c0_i32 : i32, i32
  }
  func.func @transform_1(%arg0: i32) -> (i32, i32) {
    %c0_i32 = arith.constant 0 : i32
    %c0_i32_0 = arith.constant 0 : i32
    %c0_i32_1 = arith.constant 0 : i32
    return %c0_i32, %c0_i32_0 : i32, i32
  }
  func.func @transform_2(%arg0: i32) -> (i32, i32) {
    %c0_i32 = arith.constant 0 : i32
    %c0_i32_0 = arith.constant 0 : i32
    %c0_i32_1 = arith.constant 0 : i32
    return %c0_i32, %c0_i32_0 : i32, i32
  }
  func.func @transform_3(%arg0: i32) -> (i32, i32) {
    %c0_i32 = arith.constant 0 : i32
    %c0_i32_0 = arith.constant 0 : i32
    return %arg0, %c0_i32 : i32, i32
  }
}

module attributes {stable_mosaic.version = 11 : i64} {
  func.func @_tied_row_attention_kernel(%arg0: i32, %arg1: memref<1x16x64xbf16, #tpu.memory_space<vmem>>, %arg2: memref<1x16x64xbf16, #tpu.memory_space<vmem>>, %arg3: memref<1x16x64xbf16, #tpu.memory_space<vmem>>, %arg4: memref<1x16x64xf32, #tpu.memory_space<vmem>>) attributes {dimension_semantics = [#tpu.dimension_semantics<parallel>], iteration_bounds = array<i64: 8>, scalar_prefetch = 0 : i64, scratch_operands = 0 : i64, tpu.core_type = #tpu.core_type<tc>, window_params = [{transform_indices = @transform_0, window_bounds = array<i64: 1, 16, 64>}, {transform_indices = @transform_1, window_bounds = array<i64: 1, 16, 64>}, {transform_indices = @transform_2, window_bounds = array<i64: 1, 16, 64>}, {transform_indices = @transform_3, window_bounds = array<i64: 1, 16, 64>}]} {
    %c0 = arith.constant 0 : index
    %c0_0 = arith.constant 0 : index
    %c0_1 = arith.constant 0 : index
    %0 = vector.load %arg1[%c0, %c0_0, %c0_1] : memref<1x16x64xbf16, #tpu.memory_space<vmem>>, vector<1x16x64xbf16>
    %1 = vector.shape_cast %0 : vector<1x16x64xbf16> to vector<16x64xbf16>
    %c0_2 = arith.constant 0 : index
    %c0_3 = arith.constant 0 : index
    %c0_4 = arith.constant 0 : index
    %2 = vector.load %arg2[%c0_2, %c0_3, %c0_4] : memref<1x16x64xbf16, #tpu.memory_space<vmem>>, vector<1x16x64xbf16>
    %3 = vector.shape_cast %2 : vector<1x16x64xbf16> to vector<16x64xbf16>
    %cst = arith.constant dense<0.000000e+00> : vector<16x16xf32>
    %4 = tpu.matmul %1, %3, %cst {dimension_numbers = #tpu.dot_dimension_numbers<[1], [1], [0], [0], [0, 0, 1, 0], [], []>} : vector<16x64xbf16>, vector<16x64xbf16>, vector<16x16xf32> -> vector<16x16xf32>
    %cst_5 = arith.constant 1.000000e+00 : f32
    %5 = vector.broadcast %cst_5 : f32 to vector<16x16xf32>
    %6 = arith.mulf %4, %5 : vector<16x16xf32>
    %cst_6 = arith.constant dense<0xFF800000> : vector<16xf32>
    %7 = vector.multi_reduction <maximumf>, %6, %cst_6 [1] : vector<16x16xf32> to vector<16xf32>
    %8 = vector.shape_cast %7 : vector<16xf32> to vector<16x1xf32>
    %9 = vector.broadcast %8 : vector<16x1xf32> to vector<16x16xf32>
    %10 = arith.subf %6, %9 : vector<16x16xf32>
    %11 = math.exp %10 : vector<16x16xf32>
    %cst_7 = arith.constant dense<0.000000e+00> : vector<16xf32>
    %12 = vector.multi_reduction <add>, %11, %cst_7 [1] : vector<16x16xf32> to vector<16xf32>
    %13 = vector.shape_cast %12 : vector<16xf32> to vector<16x1xf32>
    %14 = vector.broadcast %13 : vector<16x1xf32> to vector<16x16xf32>
    %15 = arith.divf %11, %14 : vector<16x16xf32>
    %16 = arith.truncf %15 : vector<16x16xf32> to vector<16x16xbf16>
    %c0_8 = arith.constant 0 : index
    %c0_9 = arith.constant 0 : index
    %c0_10 = arith.constant 0 : index
    %17 = vector.load %arg3[%c0_8, %c0_9, %c0_10] : memref<1x16x64xbf16, #tpu.memory_space<vmem>>, vector<1x16x64xbf16>
    %18 = vector.shape_cast %17 : vector<1x16x64xbf16> to vector<16x64xbf16>
    %cst_11 = arith.constant dense<0.000000e+00> : vector<16x64xf32>
    %19 = tpu.matmul %16, %18, %cst_11 {dimension_numbers = #tpu.dot_dimension_numbers<[1], [0], [0], [1], [0, 0, 1, 1], [], []>} : vector<16x16xbf16>, vector<16x64xbf16>, vector<16x64xf32> -> vector<16x64xf32>
    %c0_12 = arith.constant 0 : index
    %c0_13 = arith.constant 0 : index
    %c0_14 = arith.constant 0 : index
    %20 = vector.load %arg4[%c0_12, %c0_13, %c0_14] : memref<1x16x64xf32, #tpu.memory_space<vmem>>, vector<1x16x64xf32>
    %21 = vector.shape_cast %20 : vector<1x16x64xf32> to vector<16x64xf32>
    %22 = vector.shape_cast %19 : vector<16x64xf32> to vector<1x16x64xf32>
    tpu.vector_store %arg4[%c0_12, %c0_13, %c0_14], %22 {strides = array<i32>} : memref<1x16x64xf32, #tpu.memory_space<vmem>>, vector<1x16x64xf32>,
    return
  }
  func.func @transform_0(%arg0: i32) -> (i32, i32, i32) {
    %c0_i32 = arith.constant 0 : i32
    %c0_i32_0 = arith.constant 0 : i32
    %c0_i32_1 = arith.constant 0 : i32
    return %arg0, %c0_i32, %c0_i32_0 : i32, i32, i32
  }
  func.func @transform_1(%arg0: i32) -> (i32, i32, i32) {
    %c0_i32 = arith.constant 0 : i32
    %c0_i32_0 = arith.constant 0 : i32
    %c0_i32_1 = arith.constant 0 : i32
    return %arg0, %c0_i32, %c0_i32_0 : i32, i32, i32
  }
  func.func @transform_2(%arg0: i32) -> (i32, i32, i32) {
    %c0_i32 = arith.constant 0 : i32
    %c0_i32_0 = arith.constant 0 : i32
    %c0_i32_1 = arith.constant 0 : i32
    return %arg0, %c0_i32, %c0_i32_0 : i32, i32, i32
  }
  func.func @transform_3(%arg0: i32) -> (i32, i32, i32) {
    %c0_i32 = arith.constant 0 : i32
    %c0_i32_0 = arith.constant 0 : i32
    %c0_i32_1 = arith.constant 0 : i32
    return %arg0, %c0_i32, %c0_i32_0 : i32, i32, i32
  }
}

module attributes {stable_mosaic.version = 11 : i64} {
  func.func @_gemm_bias_kernel(%arg0: i32, %arg1: memref<256x32xbf16, #tpu.memory_space<vmem>>, %arg2: memref<32x32xbf16, #tpu.memory_space<vmem>>, %arg3: memref<1x32xf32, #tpu.memory_space<vmem>>, %arg4: memref<256x32xf32, #tpu.memory_space<vmem>>) attributes {dimension_semantics = [#tpu.dimension_semantics<parallel>], iteration_bounds = array<i64: 1>, scalar_prefetch = 0 : i64, scratch_operands = 0 : i64, tpu.core_type = #tpu.core_type<tc>, window_params = [{transform_indices = @transform_0, window_bounds = array<i64: 256, 32>}, {pipeline_mode = #tpu.pipeline_mode<synchronous>, transform_indices = @transform_1, window_bounds = array<i64: 32, 32>}, {pipeline_mode = #tpu.pipeline_mode<synchronous>, transform_indices = @transform_2, window_bounds = array<i64: 1, 32>}, {transform_indices = @transform_3, window_bounds = array<i64: 256, 32>}]} {
    %c0 = arith.constant 0 : index
    %c0_0 = arith.constant 0 : index
    %0 = vector.load %arg1[%c0, %c0_0] : memref<256x32xbf16, #tpu.memory_space<vmem>>, vector<256x32xbf16>
    %c0_1 = arith.constant 0 : index
    %c0_2 = arith.constant 0 : index
    %1 = vector.load %arg2[%c0_1, %c0_2] : memref<32x32xbf16, #tpu.memory_space<vmem>>, vector<32x32xbf16>
    %cst = arith.constant dense<0.000000e+00> : vector<256x32xf32>
    %2 = tpu.matmul %0, %1, %cst {dimension_numbers = #tpu.dot_dimension_numbers<[1], [0], [0], [1], [0, 0, 1, 1], [], []>} : vector<256x32xbf16>, vector<32x32xbf16>, vector<256x32xf32> -> vector<256x32xf32>
    %c0_3 = arith.constant 0 : index
    %c0_4 = arith.constant 0 : index
    %3 = vector.load %arg3[%c0_3, %c0_4] : memref<1x32xf32, #tpu.memory_space<vmem>>, vector<1x32xf32>
    %4 = vector.broadcast %3 : vector<1x32xf32> to vector<256x32xf32>
    %5 = arith.addf %2, %4 : vector<256x32xf32>
    %c0_5 = arith.constant 0 : index
    %c0_6 = arith.constant 0 : index
    %6 = vector.load %arg4[%c0_5, %c0_6] : memref<256x32xf32, #tpu.memory_space<vmem>>, vector<256x32xf32>
    tpu.vector_store %arg4[%c0_5, %c0_6], %5 {strides = array<i32>} : memref<256x32xf32, #tpu.memory_space<vmem>>, vector<256x32xf32>,
    return
  }
  func.func @transform_0(%arg0: i32) -> (i32, i32) {
    %c0_i32 = arith.constant 0 : i32
    %c0_i32_0 = arith.constant 0 : i32
    return %arg0, %c0_i32 : i32, i32
  }
  func.func @transform_1(%arg0: i32) -> (i32, i32) {
    %c0_i32 = arith.constant 0 : i32
    %c0_i32_0 = arith.constant 0 : i32
    %c0_i32_1 = arith.constant 0 : i32
    return %c0_i32, %c0_i32_0 : i32, i32
  }
  func.func @transform_2(%arg0: i32) -> (i32, i32) {
    %c0_i32 = arith.constant 0 : i32
    %c0_i32_0 = arith.constant 0 : i32
    %c0_i32_1 = arith.constant 0 : i32
    return %c0_i32, %c0_i32_0 : i32, i32
  }
  func.func @transform_3(%arg0: i32) -> (i32, i32) {
    %c0_i32 = arith.constant 0 : i32
    %c0_i32_0 = arith.constant 0 : i32
    return %arg0, %c0_i32 : i32, i32
  }
}

module attributes {stable_mosaic.version = 11 : i64} {
  func.func @_gemm_bias_kernel(%arg0: i32, %arg1: memref<256x32xbf16, #tpu.memory_space<vmem>>, %arg2: memref<32x96xbf16, #tpu.memory_space<vmem>>, %arg3: memref<1x96xf32, #tpu.memory_space<vmem>>, %arg4: memref<256x96xf32, #tpu.memory_space<vmem>>) attributes {dimension_semantics = [#tpu.dimension_semantics<parallel>], iteration_bounds = array<i64: 1>, scalar_prefetch = 0 : i64, scratch_operands = 0 : i64, tpu.core_type = #tpu.core_type<tc>, window_params = [{transform_indices = @transform_0, window_bounds = array<i64: 256, 32>}, {pipeline_mode = #tpu.pipeline_mode<synchronous>, transform_indices = @transform_1, window_bounds = array<i64: 32, 96>}, {pipeline_mode = #tpu.pipeline_mode<synchronous>, transform_indices = @transform_2, window_bounds = array<i64: 1, 96>}, {transform_indices = @transform_3, window_bounds = array<i64: 256, 96>}]} {
    %c0 = arith.constant 0 : index
    %c0_0 = arith.constant 0 : index
    %0 = vector.load %arg1[%c0, %c0_0] : memref<256x32xbf16, #tpu.memory_space<vmem>>, vector<256x32xbf16>
    %c0_1 = arith.constant 0 : index
    %c0_2 = arith.constant 0 : index
    %1 = vector.load %arg2[%c0_1, %c0_2] : memref<32x96xbf16, #tpu.memory_space<vmem>>, vector<32x96xbf16>
    %cst = arith.constant dense<0.000000e+00> : vector<256x96xf32>
    %2 = tpu.matmul %0, %1, %cst {dimension_numbers = #tpu.dot_dimension_numbers<[1], [0], [0], [1], [0, 0, 1, 1], [], []>} : vector<256x32xbf16>, vector<32x96xbf16>, vector<256x96xf32> -> vector<256x96xf32>
    %c0_3 = arith.constant 0 : index
    %c0_4 = arith.constant 0 : index
    %3 = vector.load %arg3[%c0_3, %c0_4] : memref<1x96xf32, #tpu.memory_space<vmem>>, vector<1x96xf32>
    %4 = vector.broadcast %3 : vector<1x96xf32> to vector<256x96xf32>
    %5 = arith.addf %2, %4 : vector<256x96xf32>
    %c0_5 = arith.constant 0 : index
    %c0_6 = arith.constant 0 : index
    %6 = vector.load %arg4[%c0_5, %c0_6] : memref<256x96xf32, #tpu.memory_space<vmem>>, vector<256x96xf32>
    tpu.vector_store %arg4[%c0_5, %c0_6], %5 {strides = array<i32>} : memref<256x96xf32, #tpu.memory_space<vmem>>, vector<256x96xf32>,
    return
  }
  func.func @transform_0(%arg0: i32) -> (i32, i32) {
    %c0_i32 = arith.constant 0 : i32
    %c0_i32_0 = arith.constant 0 : i32
    return %arg0, %c0_i32 : i32, i32
  }
  func.func @transform_1(%arg0: i32) -> (i32, i32) {
    %c0_i32 = arith.constant 0 : i32
    %c0_i32_0 = arith.constant 0 : i32
    %c0_i32_1 = arith.constant 0 : i32
    return %c0_i32, %c0_i32_0 : i32, i32
  }
  func.func @transform_2(%arg0: i32) -> (i32, i32) {
    %c0_i32 = arith.constant 0 : i32
    %c0_i32_0 = arith.constant 0 : i32
    %c0_i32_1 = arith.constant 0 : i32
    return %c0_i32, %c0_i32_0 : i32, i32
  }
  func.func @transform_3(%arg0: i32) -> (i32, i32) {
    %c0_i32 = arith.constant 0 : i32
    %c0_i32_0 = arith.constant 0 : i32
    return %arg0, %c0_i32 : i32, i32
  }
}

module attributes {stable_mosaic.version = 11 : i64} {
  func.func @_tied_row_attention_kernel(%arg0: i32, %arg1: memref<1x16x64xbf16, #tpu.memory_space<vmem>>, %arg2: memref<1x16x64xbf16, #tpu.memory_space<vmem>>, %arg3: memref<1x16x64xbf16, #tpu.memory_space<vmem>>, %arg4: memref<1x16x64xf32, #tpu.memory_space<vmem>>) attributes {dimension_semantics = [#tpu.dimension_semantics<parallel>], iteration_bounds = array<i64: 8>, scalar_prefetch = 0 : i64, scratch_operands = 0 : i64, tpu.core_type = #tpu.core_type<tc>, window_params = [{transform_indices = @transform_0, window_bounds = array<i64: 1, 16, 64>}, {transform_indices = @transform_1, window_bounds = array<i64: 1, 16, 64>}, {transform_indices = @transform_2, window_bounds = array<i64: 1, 16, 64>}, {transform_indices = @transform_3, window_bounds = array<i64: 1, 16, 64>}]} {
    %c0 = arith.constant 0 : index
    %c0_0 = arith.constant 0 : index
    %c0_1 = arith.constant 0 : index
    %0 = vector.load %arg1[%c0, %c0_0, %c0_1] : memref<1x16x64xbf16, #tpu.memory_space<vmem>>, vector<1x16x64xbf16>
    %1 = vector.shape_cast %0 : vector<1x16x64xbf16> to vector<16x64xbf16>
    %c0_2 = arith.constant 0 : index
    %c0_3 = arith.constant 0 : index
    %c0_4 = arith.constant 0 : index
    %2 = vector.load %arg2[%c0_2, %c0_3, %c0_4] : memref<1x16x64xbf16, #tpu.memory_space<vmem>>, vector<1x16x64xbf16>
    %3 = vector.shape_cast %2 : vector<1x16x64xbf16> to vector<16x64xbf16>
    %cst = arith.constant dense<0.000000e+00> : vector<16x16xf32>
    %4 = tpu.matmul %1, %3, %cst {dimension_numbers = #tpu.dot_dimension_numbers<[1], [1], [0], [0], [0, 0, 1, 0], [], []>} : vector<16x64xbf16>, vector<16x64xbf16>, vector<16x16xf32> -> vector<16x16xf32>
    %cst_5 = arith.constant 1.000000e+00 : f32
    %5 = vector.broadcast %cst_5 : f32 to vector<16x16xf32>
    %6 = arith.mulf %4, %5 : vector<16x16xf32>
    %cst_6 = arith.constant dense<0xFF800000> : vector<16xf32>
    %7 = vector.multi_reduction <maximumf>, %6, %cst_6 [1] : vector<16x16xf32> to vector<16xf32>
    %8 = vector.shape_cast %7 : vector<16xf32> to vector<16x1xf32>
    %9 = vector.broadcast %8 : vector<16x1xf32> to vector<16x16xf32>
    %10 = arith.subf %6, %9 : vector<16x16xf32>
    %11 = math.exp %10 : vector<16x16xf32>
    %cst_7 = arith.constant dense<0.000000e+00> : vector<16xf32>
    %12 = vector.multi_reduction <add>, %11, %cst_7 [1] : vector<16x16xf32> to vector<16xf32>
    %13 = vector.shape_cast %12 : vector<16xf32> to vector<16x1xf32>
    %14 = vector.broadcast %13 : vector<16x1xf32> to vector<16x16xf32>
    %15 = arith.divf %11, %14 : vector<16x16xf32>
    %16 = arith.truncf %15 : vector<16x16xf32> to vector<16x16xbf16>
    %c0_8 = arith.constant 0 : index
    %c0_9 = arith.constant 0 : index
    %c0_10 = arith.constant 0 : index
    %17 = vector.load %arg3[%c0_8, %c0_9, %c0_10] : memref<1x16x64xbf16, #tpu.memory_space<vmem>>, vector<1x16x64xbf16>
    %18 = vector.shape_cast %17 : vector<1x16x64xbf16> to vector<16x64xbf16>
    %cst_11 = arith.constant dense<0.000000e+00> : vector<16x64xf32>
    %19 = tpu.matmul %16, %18, %cst_11 {dimension_numbers = #tpu.dot_dimension_numbers<[1], [0], [0], [1], [0, 0, 1, 1], [], []>} : vector<16x16xbf16>, vector<16x64xbf16>, vector<16x64xf32> -> vector<16x64xf32>
    %c0_12 = arith.constant 0 : index
    %c0_13 = arith.constant 0 : index
    %c0_14 = arith.constant 0 : index
    %20 = vector.load %arg4[%c0_12, %c0_13, %c0_14] : memref<1x16x64xf32, #tpu.memory_space<vmem>>, vector<1x16x64xf32>
    %21 = vector.shape_cast %20 : vector<1x16x64xf32> to vector<16x64xf32>
    %22 = vector.shape_cast %19 : vector<16x64xf32> to vector<1x16x64xf32>
    tpu.vector_store %arg4[%c0_12, %c0_13, %c0_14], %22 {strides = array<i32>} : memref<1x16x64xf32, #tpu.memory_space<vmem>>, vector<1x16x64xf32>,
    return
  }
  func.func @transform_0(%arg0: i32) -> (i32, i32, i32) {
    %c0_i32 = arith.constant 0 : i32
    %c0_i32_0 = arith.constant 0 : i32
    %c0_i32_1 = arith.constant 0 : i32
    return %arg0, %c0_i32, %c0_i32_0 : i32, i32, i32
  }
  func.func @transform_1(%arg0: i32) -> (i32, i32, i32) {
    %c0_i32 = arith.constant 0 : i32
    %c0_i32_0 = arith.constant 0 : i32
    %c0_i32_1 = arith.constant 0 : i32
    return %arg0, %c0_i32, %c0_i32_0 : i32, i32, i32
  }
  func.func @transform_2(%arg0: i32) -> (i32, i32, i32) {
    %c0_i32 = arith.constant 0 : i32
    %c0_i32_0 = arith.constant 0 : i32
    %c0_i32_1 = arith.constant 0 : i32
    return %arg0, %c0_i32, %c0_i32_0 : i32, i32, i32
  }
  func.func @transform_3(%arg0: i32) -> (i32, i32, i32) {
    %c0_i32 = arith.constant 0 : i32
    %c0_i32_0 = arith.constant 0 : i32
    %c0_i32_1 = arith.constant 0 : i32
    return %arg0, %c0_i32, %c0_i32_0 : i32, i32, i32
  }
}

module attributes {stable_mosaic.version = 11 : i64} {
  func.func @_gemm_bias_kernel(%arg0: i32, %arg1: memref<256x32xbf16, #tpu.memory_space<vmem>>, %arg2: memref<32x32xbf16, #tpu.memory_space<vmem>>, %arg3: memref<1x32xf32, #tpu.memory_space<vmem>>, %arg4: memref<256x32xf32, #tpu.memory_space<vmem>>) attributes {dimension_semantics = [#tpu.dimension_semantics<parallel>], iteration_bounds = array<i64: 1>, scalar_prefetch = 0 : i64, scratch_operands = 0 : i64, tpu.core_type = #tpu.core_type<tc>, window_params = [{transform_indices = @transform_0, window_bounds = array<i64: 256, 32>}, {pipeline_mode = #tpu.pipeline_mode<synchronous>, transform_indices = @transform_1, window_bounds = array<i64: 32, 32>}, {pipeline_mode = #tpu.pipeline_mode<synchronous>, transform_indices = @transform_2, window_bounds = array<i64: 1, 32>}, {transform_indices = @transform_3, window_bounds = array<i64: 256, 32>}]} {
    %c0 = arith.constant 0 : index
    %c0_0 = arith.constant 0 : index
    %0 = vector.load %arg1[%c0, %c0_0] : memref<256x32xbf16, #tpu.memory_space<vmem>>, vector<256x32xbf16>
    %c0_1 = arith.constant 0 : index
    %c0_2 = arith.constant 0 : index
    %1 = vector.load %arg2[%c0_1, %c0_2] : memref<32x32xbf16, #tpu.memory_space<vmem>>, vector<32x32xbf16>
    %cst = arith.constant dense<0.000000e+00> : vector<256x32xf32>
    %2 = tpu.matmul %0, %1, %cst {dimension_numbers = #tpu.dot_dimension_numbers<[1], [0], [0], [1], [0, 0, 1, 1], [], []>} : vector<256x32xbf16>, vector<32x32xbf16>, vector<256x32xf32> -> vector<256x32xf32>
    %c0_3 = arith.constant 0 : index
    %c0_4 = arith.constant 0 : index
    %3 = vector.load %arg3[%c0_3, %c0_4] : memref<1x32xf32, #tpu.memory_space<vmem>>, vector<1x32xf32>
    %4 = vector.broadcast %3 : vector<1x32xf32> to vector<256x32xf32>
    %5 = arith.addf %2, %4 : vector<256x32xf32>
    %c0_5 = arith.constant 0 : index
    %c0_6 = arith.constant 0 : index
    %6 = vector.load %arg4[%c0_5, %c0_6] : memref<256x32xf32, #tpu.memory_space<vmem>>, vector<256x32xf32>
    tpu.vector_store %arg4[%c0_5, %c0_6], %5 {strides = array<i32>} : memref<256x32xf32, #tpu.memory_space<vmem>>, vector<256x32xf32>,
    return
  }
  func.func @transform_0(%arg0: i32) -> (i32, i32) {
    %c0_i32 = arith.constant 0 : i32
    %c0_i32_0 = arith.constant 0 : i32
    return %arg0, %c0_i32 : i32, i32
  }
  func.func @transform_1(%arg0: i32) -> (i32, i32) {
    %c0_i32 = arith.constant 0 : i32
    %c0_i32_0 = arith.constant 0 : i32
    %c0_i32_1 = arith.constant 0 : i32
    return %c0_i32, %c0_i32_0 : i32, i32
  }
  func.func @transform_2(%arg0: i32) -> (i32, i32) {
    %c0_i32 = arith.constant 0 : i32
    %c0_i32_0 = arith.constant 0 : i32
    %c0_i32_1 = arith.constant 0 : i32
    return %c0_i32, %c0_i32_0 : i32, i32
  }
  func.func @transform_3(%arg0: i32) -> (i32, i32) {
    %c0_i32 = arith.constant 0 : i32
    %c0_i32_0 = arith.constant 0 : i32
    return %arg0, %c0_i32 : i32, i32
  }
}

</mosaic_0001>

<bundles_post_ra>
// kernel: _forward.3
= control target key start
LH: loop header
LB: loop body
LE: loop exit
PB: predicated region body
PF: predicated region fallthrough
CT: control target
= control target key end

     0   :  { %vm147_vm0 = vcmask 261120   ;;  %vm285_vm1 = vcmask 785408   ;;  %s690_s1 = inlined_call_operand.vmem [shape: bf16[32,96], index: 1, kind: input, shape index: {}]   ;;  %s691_s0 = inlined_call_operand.vmem [shape: bf16[256,32], index: 0, kind: input, shape index: {}]   ;;  %s692_s2 = inlined_call_operand.vmem [shape: f32[1,96], index: 2, kind: input, shape index: {}]   ;;  %s693_s3 = inlined_call_operand.vmem [shape: f32[256,96], index: 3, kind: output, shape index: {}]  }
   0x1   :  { %v427_v0 = vld [vmem:[%s690_s1 + $0x8] sm:$0xff]  ;;  %v426_v1 = vld [vmem:[%s690_s1] sm:$0xff]  ;;  %v412_v10 = vld [vmem:[%s691_s0 + $0x10] sm:$0xff] }
   0x2   :  { %202 = vmatpush.bf16.msra.mxu0 %v427_v0  ;;  %428 = vmatpush.bf16.msra.mxu1 %v427_v0  ;;  %v410_v2 = vld [vmem:[%s691_s0] sm:$0xff]  ;;  %v411_v6 = vld [vmem:[%s691_s0 + $0x8] sm:$0xff]  ;;  %v416_v11 = vld [vmem:[%s691_s0 + $0x30] sm:$0xff] }
   0x3   :  { %429 = vmatpush.bf16.msra.mxu2 %v427_v0  ;;  %430 = vmatpush.bf16.msra.mxu3 %v427_v0  ;;  %v414_v3 = vld [vmem:[%s691_s0 + $0x20] sm:$0xff]  ;;  %v415_v7 = vld [vmem:[%s691_s0 + $0x28] sm:$0xff]  ;;  %v420_v12 = vld [vmem:[%s691_s0 + $0x50] sm:$0xff] }
   0x4   :  { %v418_v4 = vld [vmem:[%s691_s0 + $0x40] sm:$0xff]  ;;  %v419_v8 = vld [vmem:[%s691_s0 + $0x48] sm:$0xff]  ;;  %v424_v13 = vld [vmem:[%s691_s0 + $0x70] sm:$0xff] }
   0x5   :  { %v422_v5 = vld [vmem:[%s691_s0 + $0x60] sm:$0xff]  ;;  %v423_v9 = vld [vmem:[%s691_s0 + $0x68] sm:$0xff]  ;;  %v413_v14 = vld [vmem:[%s691_s0 + $0x18] sm:$0xff] }
   0x6   :  { %203 = vmatpush.bf16.msra.mxu0 %v426_v1  ;;  %431 = vmatpush.bf16.msra.mxu1 %v426_v1  ;;  %v417_v15 = vld [vmem:[%s691_s0 + $0x38] sm:$0xff]  ;;  %v528_v18 = vld [vmem:[%s692_s2] ss:$0 sm:$0xff] }
   0x7   :  { %432 = vmatpush.bf16.msra.mxu2 %v426_v1  ;;  %433 = vmatpush.bf16.msra.mxu3 %v426_v1  ;;  %v421_v16 = vld [vmem:[%s691_s0 + $0x58] sm:$0xff] }
   0x8   :  { %v425_v17 = vld [vmem:[%s691_s0 + $0x78] sm:$0xff] }
   0x9   :  { %394 = vmatmul.msk.bf16.vlgmr.msra.gmra.mxu0 %vm147_vm0, %v410_v2  ;;  %398 = vmatmul.msk.bf16.vlgmr.msra.gmra.mxu1 %vm147_vm0, %v414_v3 }
   0xa   :  { %402 = vmatmul.msk.bf16.vlgmr.msra.gmra.mxu2 %vm147_vm0, %v418_v4  ;;  %406 = vmatmul.msk.bf16.vlgmr.msra.gmra.mxu3 %vm147_vm0, %v422_v5 }
  0x19   :  { %395 = vmatmul.msk.bf16.gmra.mxu0 %vm147_vm0, %v411_v6  ;;  %399 = vmatmul.msk.bf16.gmra.mxu1 %vm147_vm0, %v415_v7 }
  0x1a   :  { %403 = vmatmul.msk.bf16.gmra.mxu2 %vm147_vm0, %v419_v8  ;;  %407 = vmatmul.msk.bf16.gmra.mxu3 %vm147_vm0, %v423_v9 }
  0x29   :  { %396 = vmatmul.msk.bf16.gmra.mxu0 %vm147_vm0, %v412_v10  ;;  %400 = vmatmul.msk.bf16.gmra.mxu1 %vm147_vm0, %v416_v11 }
  0x2a   :  { %404 = vmatmul.msk.bf16.gmra.mxu2 %vm147_vm0, %v420_v12  ;;  %408 = vmatmul.msk.bf16.gmra.mxu3 %vm147_vm0, %v424_v13 }
  0x39   :  { %397 = vmatmul.msk.bf16.gmra.mxu0 %vm147_vm0, %v413_v14  ;;  %401 = vmatmul.msk.bf16.gmra.mxu1 %vm147_vm0, %v417_v15 }
  0x3a   :  { %405 = vmatmul.msk.bf16.gmra.mxu2 %vm147_vm0, %v421_v16  ;;  %409 = vmatmul.msk.bf16.gmra.mxu3 %vm147_vm0, %v425_v17 }
  0x86   :  { %v205_v19 = vpop.f32.mrf.mxu0  ;;  %v225_v20 = vpop.f32.mrf.mxu1 }
  0x87   :  { %v206_v21 = vadd.f32 %v528_v18, %v205_v19  ;;  %v226_v22 = vadd.f32 %v528_v18, %v225_v20 }
  0x89   :  { %286 = vst.msk [vmem:[%s693_s3] sm:$0xff] %vm285_vm1, %v206_v21 }
  0x8a   :  { %294 = vst.msk [vmem:[%s693_s3 + $0x40] sm:$0xff] %vm285_vm1, %v226_v22 }
  0x8d   :  { %v245_v23 = vpop.f32.mrf.mxu2  ;;  %v265_v24 = vpop.f32.mrf.mxu3 }
  0x8e   :  { %v246_v25 = vadd.f32 %v528_v18, %v245_v23  ;;  %v266_v26 = vadd.f32 %v528_v18, %v265_v24  ;;  %v207_v27 = vpop.f32.mrf.mxu0  ;;  %v227_v28 = vpop.f32.mrf.mxu1 }
  0x8f   :  { %v208_v29 = vadd.f32 %v528_v18, %v207_v27  ;;  %v228_v30 = vadd.f32 %v528_v18, %v227_v28 }
  0x90   :  { %302 = vst.msk [vmem:[%s693_s3 + $0x80] sm:$0xff] %vm285_vm1, %v246_v25 }
  0x91   :  { %310 = vst.msk [vmem:[%s693_s3 + $0xc0] sm:$0xff] %vm285_vm1, %v266_v26 }
  0x92   :  { %287 = vst.msk [vmem:[%s693_s3 + $0x8] sm:$0xff] %vm285_vm1, %v208_v29 }
  0x93   :  { %295 = vst.msk [vmem:[%s693_s3 + $0x48] sm:$0xff] %vm285_vm1, %v228_v30 }
  0x95   :  { %v247_v31 = vpop.f32.mrf.mxu2  ;;  %v267_v32 = vpop.f32.mrf.mxu3 }
  0x96   :  { %v248_v33 = vadd.f32 %v528_v18, %v247_v31  ;;  %v268_v34 = vadd.f32 %v528_v18, %v267_v32  ;;  %v210_v35 = vpop.f32.mrf.mxu0  ;;  %v230_v36 = vpop.f32.mrf.mxu1 }
  0x97   :  { %v211_v37 = vadd.f32 %v528_v18, %v210_v35  ;;  %v231_v38 = vadd.f32 %v528_v18, %v230_v36 }
  0x98   :  { %303 = vst.msk [vmem:[%s693_s3 + $0x88] sm:$0xff] %vm285_vm1, %v248_v33 }
  0x99   :  { %311 = vst.msk [vmem:[%s693_s3 + $0xc8] sm:$0xff] %vm285_vm1, %v268_v34 }
  0x9a   :  { %288 = vst.msk [vmem:[%s693_s3 + $0x10] sm:$0xff] %vm285_vm1, %v211_v37 }
  0x9b   :  { %296 = vst.msk [vmem:[%s693_s3 + $0x50] sm:$0xff] %vm285_vm1, %v231_v38 }
  0x9d   :  { %v250_v39 = vpop.f32.mrf.mxu2  ;;  %v270_v40 = vpop.f32.mrf.mxu3 }
  0x9e   :  { %v251_v41 = vadd.f32 %v528_v18, %v250_v39  ;;  %v271_v42 = vadd.f32 %v528_v18, %v270_v40  ;;  %v212_v43 = vpop.f32.mrf.mxu0  ;;  %v232_v44 = vpop.f32.mrf.mxu1 }
  0x9f   :  { %v213_v45 = vadd.f32 %v528_v18, %v212_v43  ;;  %v233_v46 = vadd.f32 %v528_v18, %v232_v44 }
  0xa0   :  { %304 = vst.msk [vmem:[%s693_s3 + $0x90] sm:$0xff] %vm285_vm1, %v251_v41 }
  0xa1   :  { %312 = vst.msk [vmem:[%s693_s3 + $0xd0] sm:$0xff] %vm285_vm1, %v271_v42 }
  0xa2   :  { %289 = vst.msk [vmem:[%s693_s3 + $0x18] sm:$0xff] %vm285_vm1, %v213_v45 }
  0xa3   :  { %297 = vst.msk [vmem:[%s693_s3 + $0x58] sm:$0xff] %vm285_vm1, %v233_v46 }
  0xa5   :  { %v252_v47 = vpop.f32.mrf.mxu2  ;;  %v272_v48 = vpop.f32.mrf.mxu3 }
  0xa6   :  { %v253_v49 = vadd.f32 %v528_v18, %v252_v47  ;;  %v273_v50 = vadd.f32 %v528_v18, %v272_v48  ;;  %v215_v51 = vpop.f32.mrf.mxu0  ;;  %v235_v52 = vpop.f32.mrf.mxu1 }
  0xa7   :  { %v216_v53 = vadd.f32 %v528_v18, %v215_v51  ;;  %v236_v54 = vadd.f32 %v528_v18, %v235_v52 }
  0xa8   :  { %305 = vst.msk [vmem:[%s693_s3 + $0x98] sm:$0xff] %vm285_vm1, %v253_v49 }
  0xa9   :  { %313 = vst.msk [vmem:[%s693_s3 + $0xd8] sm:$0xff] %vm285_vm1, %v273_v50 }
  0xaa   :  { %290 = vst.msk [vmem:[%s693_s3 + $0x20] sm:$0xff] %vm285_vm1, %v216_v53 }
  0xab   :  { %298 = vst.msk [vmem:[%s693_s3 + $0x60] sm:$0xff] %vm285_vm1, %v236_v54 }
  0xad   :  { %v255_v55 = vpop.f32.mrf.mxu2  ;;  %v275_v56 = vpop.f32.mrf.mxu3 }
  0xae   :  { %v256_v57 = vadd.f32 %v528_v18, %v255_v55  ;;  %v276_v58 = vadd.f32 %v528_v18, %v275_v56  ;;  %v217_v59 = vpop.f32.mrf.mxu0  ;;  %v237_v60 = vpop.f32.mrf.mxu1 }
  0xaf   :  { %v218_v61 = vadd.f32 %v528_v18, %v217_v59  ;;  %v238_v62 = vadd.f32 %v528_v18, %v237_v60 }
  0xb0   :  { %306 = vst.msk [vmem:[%s693_s3 + $0xa0] sm:$0xff] %vm285_vm1, %v256_v57 }
  0xb1   :  { %314 = vst.msk [vmem:[%s693_s3 + $0xe0] sm:$0xff] %vm285_vm1, %v276_v58 }
  0xb2   :  { %291 = vst.msk [vmem:[%s693_s3 + $0x28] sm:$0xff] %vm285_vm1, %v218_v61 }
  0xb3   :  { %299 = vst.msk [vmem:[%s693_s3 + $0x68] sm:$0xff] %vm285_vm1, %v238_v62 }
  0xb5   :  { %v257_v63 = vpop.f32.mrf.mxu2  ;;  %v277_v0 = vpop.f32.mrf.mxu3 }
  0xb6   :  { %v258_v1 = vadd.f32 %v528_v18, %v257_v63  ;;  %v278_v2 = vadd.f32 %v528_v18, %v277_v0  ;;  %v220_v3 = vpop.f32.mrf.mxu0  ;;  %v240_v4 = vpop.f32.mrf.mxu1 }
  0xb7   :  { %v221_v5 = vadd.f32 %v528_v18, %v220_v3  ;;  %v241_v6 = vadd.f32 %v528_v18, %v240_v4 }
  0xb8   :  { %307 = vst.msk [vmem:[%s693_s3 + $0xa8] sm:$0xff] %vm285_vm1, %v258_v1 }
  0xb9   :  { %315 = vst.msk [vmem:[%s693_s3 + $0xe8] sm:$0xff] %vm285_vm1, %v278_v2 }
  0xba   :  { %292 = vst.msk [vmem:[%s693_s3 + $0x30] sm:$0xff] %vm285_vm1, %v221_v5 }
  0xbb   :  { %300 = vst.msk [vmem:[%s693_s3 + $0x70] sm:$0xff] %vm285_vm1, %v241_v6 }
  0xbd   :  { %v260_v7 = vpop.f32.mrf.mxu2  ;;  %v280_v8 = vpop.f32.mrf.mxu3 }
  0xbe   :  { %v261_v9 = vadd.f32 %v528_v18, %v260_v7  ;;  %v281_v10 = vadd.f32 %v528_v18, %v280_v8  ;;  %v222_v11 = vpop.f32.mrf.mxu0  ;;  %v242_v12 = vpop.f32.mrf.mxu1 }
  0xbf   :  { %v223_v13 = vadd.f32 %v528_v18, %v222_v11  ;;  %v243_v14 = vadd.f32 %v528_v18, %v242_v12 }
  0xc0   :  { %308 = vst.msk [vmem:[%s693_s3 + $0xb0] sm:$0xff] %vm285_vm1, %v261_v9 }
  0xc1   :  { %316 = vst.msk [vmem:[%s693_s3 + $0xf0] sm:$0xff] %vm285_vm1, %v281_v10 }
  0xc2   :  { %293 = vst.msk [vmem:[%s693_s3 + $0x38] sm:$0xff] %vm285_vm1, %v223_v13 }
  0xc3   :  { %301 = vst.msk [vmem:[%s693_s3 + $0x78] sm:$0xff] %vm285_vm1, %v243_v14 }
  0xc5   :  { %v262_v15 = vpop.f32.mrf.mxu2  ;;  %v282_v16 = vpop.f32.mrf.mxu3 }
  0xc6   :  { %v263_v17 = vadd.f32 %v528_v18, %v262_v15  ;;  %v283_v19 = vadd.f32 %v528_v18, %v282_v16 }
  0xc8   :  { %309 = vst.msk [vmem:[%s693_s3 + $0xb8] sm:$0xff] %vm285_vm1, %v263_v17 }
  0xc9   :  { %317 = vst.msk [vmem:[%s693_s3 + $0xf8] sm:$0xff] %vm285_vm1, %v283_v19 }

// kernel: _forward.4
= control target key start
LH: loop header
LB: loop body
LE: loop exit
PB: predicated region body
PF: predicated region fallthrough
CT: control target
= control target key end

     0   :  { %s483_s12 = smov 0   ;;  %s524_s0 = inlined_call_operand.vmem [shape: bf16[8,16,64], index: 0, kind: input, shape index: {}]   ;;  %s525_s1 = inlined_call_operand.vmem [shape: bf16[8,16,64], index: 1, kind: input, shape index: {}]   ;;  %s526_s2 = inlined_call_operand.vmem [shape: bf16[8,16,64], index: 2, kind: input, shape index: {}]   ;;  %s527_s3 = inlined_call_operand.vmem [shape: f32[8,16,64], index: 3, kind: output, shape index: {}]  }
   0x1 LB: > { %s403_s13 = sadd.s32 4294967295, %s461_s12   ;;  %p407_p0 = scmp.ge.s32.totalorder %s461_s12, 1  ;;  %s461_s12 = sphi %s483_s12, %s13_s12  }
   0x2   : > { %p157_p1 = scmp.lt.s32.totalorder %s461_s12, 9 }
   0x4   : > { %p158_p2 = pnand %p407_p0, %p157_p1 }
   0x5   : > { %p191_p3 = scmp.lt.s32.totalorder (!%p158_p2), %s403_s13, 7 }
   0x6   : > { %161 = sbr.rel (%p158_p2) target bundleno = 558 (0x22e), region = 32 }
   0xb   : > { %s529_s13 = smov (!%p191_p3, %s403_s13), 7  ;;  %vm226_vm0 = vcmask 523264   ;;  %vm247_vm1 = vcmask 130048  }
   0xc   : > { %s494_s14 = sshll.u32 %s529_s13, 3  ;;  %s435_s24 = sshll.u32 %s529_s13, 4 }
   0xd   : > { %s200_s17 = scalar_lea.vmem %s525_s1, %s494_s14  ;;  %s195_s20 = scalar_lea.vmem %s524_s0, %s494_s14 }
   0xe   : > { %v437_v0 = vld [vmem:[%s200_s17] sm:$0xff]  ;;  %s205_s23 = scalar_lea.vmem %s526_s2, %s494_s14  ;;  %s210_s27 = scalar_lea.vmem %s527_s3, %s435_s24 }
   0xf   : > { %v231_v1 = vsel %vm226_vm0, %v437_v0, 0  ;;  %v436_v2 = vld [vmem:[%s195_s20] sm:$0xff] }
  0x10   : > { %240 = vmatpush.bf16.xpose.msra.mxu0 %v231_v1  ;;  %v438_v17 = vld [vmem:[%s205_s23] sm:$0xff] }
  0x11   : > { %315 = vmatpush.bf16.msra.mxu1 %v438_v17 }
  0x17   : > { %424 = vmatmul.msk.bf16.vlgmr.msra.gmra.mxu0 %vm226_vm0, %v436_v2 }
  0x94   : > { %v242_v3 = vpop.f32.mrf.mxu0 }
  0x95   : > { %v248_v4 = vsel %vm247_vm1, %v242_v3, -inf }
  0x96   : > { %249 = vmax.xlane.f32.xlu0 %v248_v4 }
  0x9c   : > { %v244_v5 = vpop.f32.mrf.mxu0 }
  0x9d   : > { %v251_v6 = vsel %vm247_vm1, %v244_v5, -inf }
  0x9e   : > { %252 = vmax.xlane.f32.xlu0 %v251_v6 }
 0x109   : > { %v250_v7 = vpop.xlane.xlu0 %249 }
 0x10a   : > { %v254_v8 = vsub.f32 %v242_v3, %v250_v7 }
 0x10c   : > { %v256_v9 = vmul.f32 1.442695, %v254_v8 }
 0x10e   : > { %447 = vpow2.f32 %v256_v9 }
 0x111   : > { %v253_v10 = vpop.xlane.xlu0 %252 }
 0x112   : > { %v255_v11 = vsub.f32 %v244_v5, %v253_v10 }
 0x114   : > { %v448_v12 = vpop.eup %447  ;;  %v258_v13 = vmul.f32 1.442695, %v255_v11 }
 0x115   : > { %v260_v14 = vsel %vm247_vm1, %v448_v12, 0.0 }
 0x116   : > { %449 = vpow2.f32 %v258_v13  ;;  %261 = vadd.xlane.f32.xlu1 %v260_v14 }
 0x11c   : > { %v450_v15 = vpop.eup %449 }
 0x11d   : > { %v263_v16 = vsel %vm247_vm1, %v450_v15, 0.0 }
 0x11e   : > { %264 = vadd.xlane.f32.xlu1 %v263_v16 }
 0x189   : > { %v262_v18 = vpop.xlane.xlu1 %261 }
 0x18a   : > { %451 = vrcp.f32 %v262_v18  ;;  %v277_v27 = vand.u32 2147483648, %v262_v18  ;;  %vm271_vm3 = vweird.f32 %v262_v18  ;;  %v275_v28 = vand.u32 2147483647, %v262_v18 }
 0x18c   : > { %v278_v34 = vor.u32 1.1754944e-38, %v277_v27  ;;  %vm276_vm6 = vcmp.eq.f32.partialorder %v275_v28, 8.507059e+37 }
 0x190   : > { %v452_v19 = vpop.eup %451 }
 0x191   : > { %v267_v20 = vmul.f32 %v452_v19, %v262_v18  ;;  %v265_v21 = vpop.xlane.xlu1 %264  ;;  %vm272_vm2 = vweird.f32 %v452_v19 }
 0x192   : > { %453 = vrcp.f32 %v265_v21  ;;  %vm273_vm4 = vmor %vm271_vm3, %vm272_vm2  ;;  %v292_v30 = vand.u32 2147483648, %v265_v21  ;;  %v290_v32 = vand.u32 2147483647, %v265_v21  ;;  %vm286_vm7 = vweird.f32 %v265_v21 }
 0x193   : > { %v268_v22 = vsub.f32 1.0, %v267_v20 }
 0x194   : > { %v293_v36 = vor.u32 1.1754944e-38, %v292_v30  ;;  %vm291_vm9 = vcmp.eq.f32.partialorder %v290_v32, 8.507059e+37 }
 0x195   : > { %v269_v23 = vmul.f32 %v452_v19, %v268_v22 }
 0x197   : > { %v270_v25 = vadd.f32 %v452_v19, %v269_v23 }
 0x198   : > { %v454_v24 = vpop.eup %453 }
 0x199   : > { %v282_v26 = vmul.f32 %v454_v24, %v265_v21  ;;  %vm287_vm5 = vweird.f32 %v454_v24  ;;  %v274_v33 = vsel %vm273_vm4, %v452_v19, %v270_v25 }
 0x19a   : > { %vm288_vm8 = vmor %vm286_vm7, %vm287_vm5  ;;  %v279_v37 = vsel %vm276_vm6, %v278_v34, %v274_v33 }
 0x19b   : > { %v283_v29 = vsub.f32 1.0, %v282_v26  ;;  %v280_v40 = vmul.f32 %v448_v12, %v279_v37 }
 0x19d   : > { %v284_v31 = vmul.f32 %v454_v24, %v283_v29 }
 0x19f   : > { %v285_v35 = vadd.f32 %v454_v24, %v284_v31 }
 0x1a1   : > { %v289_v38 = vsel %vm288_vm8, %v454_v24, %v285_v35 }
 0x1a2   : > { %v294_v39 = vsel %vm291_vm9, %v293_v36, %v289_v38 }
 0x1a3   : > { %v295_v41 = vmul.f32 %v450_v15, %v294_v39 }
 0x1a5   : > { %v296_v42 = vpack.c.bf16 %v295_v41, %v280_v40 }
 0x1a7   : > { %429 = vmatmul.msk.bf16.vlgmr.msra.gmra.mxu1 %vm247_vm1, %v296_v42 }
 0x224   : > { %v317_v43 = vpop.f32.mrf.mxu1 }
 0x225   : > { %322 = vst.msk [vmem:[%s210_s27] sm:$0xff] %vm226_vm0, %v317_v43 }
 0x22c   : > { %v319_v44 = vpop.f32.mrf.mxu1 }
 0x22d   : > { %323 = vst.msk [vmem:[%s210_s27 + $0x8] sm:$0xff] %vm226_vm0, %v319_v44 }
 0x22e PF: > { %s13_s12 = sadd.s32 1, %s461_s12  }
 0x22f   : > { %p10_p4 = scmp.ge.s32.totalorder %s13_s12, 10  }
 0x231   :  { %12 = sbr.rel (!%p10_p4) target bundleno = 1 (0x1), region = 68 }

// kernel: _forward.5
= control target key start
LH: loop header
LB: loop body
LE: loop exit
PB: predicated region body
PF: predicated region fallthrough
CT: control target
= control target key end

     0   :  { %vm147_vm0 = vcmask 261120   ;;  %s689_s1 = inlined_call_operand.vmem [shape: bf16[32,32], index: 1, kind: input, shape index: {}]   ;;  %s690_s0 = inlined_call_operand.vmem [shape: bf16[256,32], index: 0, kind: input, shape index: {}]   ;;  %s691_s2 = inlined_call_operand.vmem [shape: f32[1,32], index: 2, kind: input, shape index: {}]   ;;  %s692_s3 = inlined_call_operand.vmem [shape: f32[256,32], index: 3, kind: output, shape index: {}]  }
   0x1   :  { %v426_v0 = vld [vmem:[%s689_s1 + $0x8] sm:$0xff]  ;;  %v425_v1 = vld [vmem:[%s689_s1] sm:$0xff]  ;;  %v411_v10 = vld [vmem:[%s690_s0 + $0x10] sm:$0xff] }
   0x2   :  { %202 = vmatpush.bf16.msra.mxu0 %v426_v0  ;;  %427 = vmatpush.bf16.msra.mxu1 %v426_v0  ;;  %v409_v2 = vld [vmem:[%s690_s0] sm:$0xff]  ;;  %v410_v6 = vld [vmem:[%s690_s0 + $0x8] sm:$0xff]  ;;  %v415_v11 = vld [vmem:[%s690_s0 + $0x30] sm:$0xff] }
   0x3   :  { %428 = vmatpush.bf16.msra.mxu2 %v426_v0  ;;  %429 = vmatpush.bf16.msra.mxu3 %v426_v0  ;;  %v413_v3 = vld [vmem:[%s690_s0 + $0x20] sm:$0xff]  ;;  %v414_v7 = vld [vmem:[%s690_s0 + $0x28] sm:$0xff]  ;;  %v419_v12 = vld [vmem:[%s690_s0 + $0x50] sm:$0xff] }
   0x4   :  { %v417_v4 = vld [vmem:[%s690_s0 + $0x40] sm:$0xff]  ;;  %v418_v8 = vld [vmem:[%s690_s0 + $0x48] sm:$0xff]  ;;  %v423_v13 = vld [vmem:[%s690_s0 + $0x70] sm:$0xff] }
   0x5   :  { %v421_v5 = vld [vmem:[%s690_s0 + $0x60] sm:$0xff]  ;;  %v422_v9 = vld [vmem:[%s690_s0 + $0x68] sm:$0xff]  ;;  %v412_v14 = vld [vmem:[%s690_s0 + $0x18] sm:$0xff] }
   0x6   :  { %203 = vmatpush.bf16.msra.mxu0 %v425_v1  ;;  %430 = vmatpush.bf16.msra.mxu1 %v425_v1  ;;  %v416_v15 = vld [vmem:[%s690_s0 + $0x38] sm:$0xff]  ;;  %v527_v18 = vld [vmem:[%s691_s2] ss:$0 sm:$0xff] }
   0x7   :  { %431 = vmatpush.bf16.msra.mxu2 %v425_v1  ;;  %432 = vmatpush.bf16.msra.mxu3 %v425_v1  ;;  %v420_v16 = vld [vmem:[%s690_s0 + $0x58] sm:$0xff] }
   0x8   :  { %v424_v17 = vld [vmem:[%s690_s0 + $0x78] sm:$0xff] }
   0x9   :  { %393 = vmatmul.msk.bf16.vlgmr.msra.gmra.mxu0 %vm147_vm0, %v409_v2  ;;  %397 = vmatmul.msk.bf16.vlgmr.msra.gmra.mxu1 %vm147_vm0, %v413_v3 }
   0xa   :  { %401 = vmatmul.msk.bf16.vlgmr.msra.gmra.mxu2 %vm147_vm0, %v417_v4  ;;  %405 = vmatmul.msk.bf16.vlgmr.msra.gmra.mxu3 %vm147_vm0, %v421_v5 }
  0x19   :  { %394 = vmatmul.msk.bf16.gmra.mxu0 %vm147_vm0, %v410_v6  ;;  %398 = vmatmul.msk.bf16.gmra.mxu1 %vm147_vm0, %v414_v7 }
  0x1a   :  { %402 = vmatmul.msk.bf16.gmra.mxu2 %vm147_vm0, %v418_v8  ;;  %406 = vmatmul.msk.bf16.gmra.mxu3 %vm147_vm0, %v422_v9 }
  0x29   :  { %395 = vmatmul.msk.bf16.gmra.mxu0 %vm147_vm0, %v411_v10  ;;  %399 = vmatmul.msk.bf16.gmra.mxu1 %vm147_vm0, %v415_v11 }
  0x2a   :  { %403 = vmatmul.msk.bf16.gmra.mxu2 %vm147_vm0, %v419_v12  ;;  %407 = vmatmul.msk.bf16.gmra.mxu3 %vm147_vm0, %v423_v13 }
  0x39   :  { %396 = vmatmul.msk.bf16.gmra.mxu0 %vm147_vm0, %v412_v14  ;;  %400 = vmatmul.msk.bf16.gmra.mxu1 %vm147_vm0, %v416_v15 }
  0x3a   :  { %404 = vmatmul.msk.bf16.gmra.mxu2 %vm147_vm0, %v420_v16  ;;  %408 = vmatmul.msk.bf16.gmra.mxu3 %vm147_vm0, %v424_v17 }
  0x86   :  { %v205_v19 = vpop.f32.mrf.mxu0  ;;  %v225_v20 = vpop.f32.mrf.mxu1 }
  0x87   :  { %v206_v21 = vadd.f32 %v527_v18, %v205_v19  ;;  %v226_v22 = vadd.f32 %v527_v18, %v225_v20 }
  0x89   :  { %285 = vst.msk [vmem:[%s692_s3] sm:$0xff] %vm147_vm0, %v206_v21 }
  0x8a   :  { %293 = vst.msk [vmem:[%s692_s3 + $0x40] sm:$0xff] %vm147_vm0, %v226_v22 }
  0x8d   :  { %v245_v23 = vpop.f32.mrf.mxu2  ;;  %v265_v24 = vpop.f32.mrf.mxu3 }
  0x8e   :  { %v246_v25 = vadd.f32 %v527_v18, %v245_v23  ;;  %v266_v26 = vadd.f32 %v527_v18, %v265_v24  ;;  %v207_v27 = vpop.f32.mrf.mxu0  ;;  %v227_v28 = vpop.f32.mrf.mxu1 }
  0x8f   :  { %v208_v29 = vadd.f32 %v527_v18, %v207_v27  ;;  %v228_v30 = vadd.f32 %v527_v18, %v227_v28 }
  0x90   :  { %301 = vst.msk [vmem:[%s692_s3 + $0x80] sm:$0xff] %vm147_vm0, %v246_v25 }
  0x91   :  { %309 = vst.msk [vmem:[%s692_s3 + $0xc0] sm:$0xff] %vm147_vm0, %v266_v26 }
  0x92   :  { %286 = vst.msk [vmem:[%s692_s3 + $0x8] sm:$0xff] %vm147_vm0, %v208_v29 }
  0x93   :  { %294 = vst.msk [vmem:[%s692_s3 + $0x48] sm:$0xff] %vm147_vm0, %v228_v30 }
  0x95   :  { %v247_v31 = vpop.f32.mrf.mxu2  ;;  %v267_v32 = vpop.f32.mrf.mxu3 }
  0x96   :  { %v248_v33 = vadd.f32 %v527_v18, %v247_v31  ;;  %v268_v34 = vadd.f32 %v527_v18, %v267_v32  ;;  %v210_v35 = vpop.f32.mrf.mxu0  ;;  %v230_v36 = vpop.f32.mrf.mxu1 }
  0x97   :  { %v211_v37 = vadd.f32 %v527_v18, %v210_v35  ;;  %v231_v38 = vadd.f32 %v527_v18, %v230_v36 }
  0x98   :  { %302 = vst.msk [vmem:[%s692_s3 + $0x88] sm:$0xff] %vm147_vm0, %v248_v33 }
  0x99   :  { %310 = vst.msk [vmem:[%s692_s3 + $0xc8] sm:$0xff] %vm147_vm0, %v268_v34 }
  0x9a   :  { %287 = vst.msk [vmem:[%s692_s3 + $0x10] sm:$0xff] %vm147_vm0, %v211_v37 }
  0x9b   :  { %295 = vst.msk [vmem:[%s692_s3 + $0x50] sm:$0xff] %vm147_vm0, %v231_v38 }
  0x9d   :  { %v250_v39 = vpop.f32.mrf.mxu2  ;;  %v270_v40 = vpop.f32.mrf.mxu3 }
  0x9e   :  { %v251_v41 = vadd.f32 %v527_v18, %v250_v39  ;;  %v271_v42 = vadd.f32 %v527_v18, %v270_v40  ;;  %v212_v43 = vpop.f32.mrf.mxu0  ;;  %v232_v44 = vpop.f32.mrf.mxu1 }
  0x9f   :  { %v213_v45 = vadd.f32 %v527_v18, %v212_v43  ;;  %v233_v46 = vadd.f32 %v527_v18, %v232_v44 }
  0xa0   :  { %303 = vst.msk [vmem:[%s692_s3 + $0x90] sm:$0xff] %vm147_vm0, %v251_v41 }
  0xa1   :  { %311 = vst.msk [vmem:[%s692_s3 + $0xd0] sm:$0xff] %vm147_vm0, %v271_v42 }
  0xa2   :  { %288 = vst.msk [vmem:[%s692_s3 + $0x18] sm:$0xff] %vm147_vm0, %v213_v45 }
  0xa3   :  { %296 = vst.msk [vmem:[%s692_s3 + $0x58] sm:$0xff] %vm147_vm0, %v233_v46 }
  0xa5   :  { %v252_v47 = vpop.f32.mrf.mxu2  ;;  %v272_v48 = vpop.f32.mrf.mxu3 }
  0xa6   :  { %v253_v49 = vadd.f32 %v527_v18, %v252_v47  ;;  %v273_v50 = vadd.f32 %v527_v18, %v272_v48  ;;  %v215_v51 = vpop.f32.mrf.mxu0  ;;  %v235_v52 = vpop.f32.mrf.mxu1 }
  0xa7   :  { %v216_v53 = vadd.f32 %v527_v18, %v215_v51  ;;  %v236_v54 = vadd.f32 %v527_v18, %v235_v52 }
  0xa8   :  { %304 = vst.msk [vmem:[%s692_s3 + $0x98] sm:$0xff] %vm147_vm0, %v253_v49 }
  0xa9   :  { %312 = vst.msk [vmem:[%s692_s3 + $0xd8] sm:$0xff] %vm147_vm0, %v273_v50 }
  0xaa   :  { %289 = vst.msk [vmem:[%s692_s3 + $0x20] sm:$0xff] %vm147_vm0, %v216_v53 }
  0xab   :  { %297 = vst.msk [vmem:[%s692_s3 + $0x60] sm:$0xff] %vm147_vm0, %v236_v54 }
  0xad   :  { %v255_v55 = vpop.f32.mrf.mxu2  ;;  %v275_v56 = vpop.f32.mrf.mxu3 }
  0xae   :  { %v256_v57 = vadd.f32 %v527_v18, %v255_v55  ;;  %v276_v58 = vadd.f32 %v527_v18, %v275_v56  ;;  %v217_v59 = vpop.f32.mrf.mxu0  ;;  %v237_v60 = vpop.f32.mrf.mxu1 }
  0xaf   :  { %v218_v61 = vadd.f32 %v527_v18, %v217_v59  ;;  %v238_v62 = vadd.f32 %v527_v18, %v237_v60 }
  0xb0   :  { %305 = vst.msk [vmem:[%s692_s3 + $0xa0] sm:$0xff] %vm147_vm0, %v256_v57 }
  0xb1   :  { %313 = vst.msk [vmem:[%s692_s3 + $0xe0] sm:$0xff] %vm147_vm0, %v276_v58 }
  0xb2   :  { %290 = vst.msk [vmem:[%s692_s3 + $0x28] sm:$0xff] %vm147_vm0, %v218_v61 }
  0xb3   :  { %298 = vst.msk [vmem:[%s692_s3 + $0x68] sm:$0xff] %vm147_vm0, %v238_v62 }
  0xb5   :  { %v257_v63 = vpop.f32.mrf.mxu2  ;;  %v277_v0 = vpop.f32.mrf.mxu3 }
  0xb6   :  { %v258_v1 = vadd.f32 %v527_v18, %v257_v63  ;;  %v278_v2 = vadd.f32 %v527_v18, %v277_v0  ;;  %v220_v3 = vpop.f32.mrf.mxu0  ;;  %v240_v4 = vpop.f32.mrf.mxu1 }
  0xb7   :  { %v221_v5 = vadd.f32 %v527_v18, %v220_v3  ;;  %v241_v6 = vadd.f32 %v527_v18, %v240_v4 }
  0xb8   :  { %306 = vst.msk [vmem:[%s692_s3 + $0xa8] sm:$0xff] %vm147_vm0, %v258_v1 }
  0xb9   :  { %314 = vst.msk [vmem:[%s692_s3 + $0xe8] sm:$0xff] %vm147_vm0, %v278_v2 }
  0xba   :  { %291 = vst.msk [vmem:[%s692_s3 + $0x30] sm:$0xff] %vm147_vm0, %v221_v5 }
  0xbb   :  { %299 = vst.msk [vmem:[%s692_s3 + $0x70] sm:$0xff] %vm147_vm0, %v241_v6 }
  0xbd   :  { %v260_v7 = vpop.f32.mrf.mxu2  ;;  %v280_v8 = vpop.f32.mrf.mxu3 }
  0xbe   :  { %v261_v9 = vadd.f32 %v527_v18, %v260_v7  ;;  %v281_v10 = vadd.f32 %v527_v18, %v280_v8  ;;  %v222_v11 = vpop.f32.mrf.mxu0  ;;  %v242_v12 = vpop.f32.mrf.mxu1 }
  0xbf   :  { %v223_v13 = vadd.f32 %v527_v18, %v222_v11  ;;  %v243_v14 = vadd.f32 %v527_v18, %v242_v12 }
  0xc0   :  { %307 = vst.msk [vmem:[%s692_s3 + $0xb0] sm:$0xff] %vm147_vm0, %v261_v9 }
  0xc1   :  { %315 = vst.msk [vmem:[%s692_s3 + $0xf0] sm:$0xff] %vm147_vm0, %v281_v10 }
  0xc2   :  { %292 = vst.msk [vmem:[%s692_s3 + $0x38] sm:$0xff] %vm147_vm0, %v223_v13 }
  0xc3   :  { %300 = vst.msk [vmem:[%s692_s3 + $0x78] sm:$0xff] %vm147_vm0, %v243_v14 }
  0xc5   :  { %v262_v15 = vpop.f32.mrf.mxu2  ;;  %v282_v16 = vpop.f32.mrf.mxu3 }
  0xc6   :  { %v263_v17 = vadd.f32 %v527_v18, %v262_v15  ;;  %v283_v19 = vadd.f32 %v527_v18, %v282_v16 }
  0xc8   :  { %308 = vst.msk [vmem:[%s692_s3 + $0xb8] sm:$0xff] %vm147_vm0, %v263_v17 }
  0xc9   :  { %316 = vst.msk [vmem:[%s692_s3 + $0xf8] sm:$0xff] %vm147_vm0, %v283_v19 }

// kernel: _forward.3
= control target key start
LH: loop header
LB: loop body
LE: loop exit
PB: predicated region body
PF: predicated region fallthrough
CT: control target
= control target key end

     0   :  { %vm147_vm0 = vcmask 261120   ;;  %vm285_vm1 = vcmask 785408   ;;  %s690_s1 = inlined_call_operand.vmem [shape: bf16[32,96], index: 1, kind: input, shape index: {}]   ;;  %s691_s0 = inlined_call_operand.vmem [shape: bf16[256,32], index: 0, kind: input, shape index: {}]   ;;  %s692_s2 = inlined_call_operand.vmem [shape: f32[1,96], index: 2, kind: input, shape index: {}]   ;;  %s693_s3 = inlined_call_operand.vmem [shape: f32[256,96], index: 3, kind: output, shape index: {}]  }
   0x1   :  { %v427_v0 = vld [vmem:[%s690_s1 + $0x8] sm:$0xff]  ;;  %v426_v1 = vld [vmem:[%s690_s1] sm:$0xff]  ;;  %v412_v10 = vld [vmem:[%s691_s0 + $0x10] sm:$0xff] }
   0x2   :  { %202 = vmatpush.bf16.msra.mxu0 %v427_v0  ;;  %428 = vmatpush.bf16.msra.mxu1 %v427_v0  ;;  %v410_v2 = vld [vmem:[%s691_s0] sm:$0xff]  ;;  %v411_v6 = vld [vmem:[%s691_s0 + $0x8] sm:$0xff]  ;;  %v416_v11 = vld [vmem:[%s691_s0 + $0x30] sm:$0xff] }
   0x3   :  { %429 = vmatpush.bf16.msra.mxu2 %v427_v0  ;;  %430 = vmatpush.bf16.msra.mxu3 %v427_v0  ;;  %v414_v3 = vld [vmem:[%s691_s0 + $0x20] sm:$0xff]  ;;  %v415_v7 = vld [vmem:[%s691_s0 + $0x28] sm:$0xff]  ;;  %v420_v12 = vld [vmem:[%s691_s0 + $0x50] sm:$0xff] }
   0x4   :  { %v418_v4 = vld [vmem:[%s691_s0 + $0x40] sm:$0xff]  ;;  %v419_v8 = vld [vmem:[%s691_s0 + $0x48] sm:$0xff]  ;;  %v424_v13 = vld [vmem:[%s691_s0 + $0x70] sm:$0xff] }
   0x5   :  { %v422_v5 = vld [vmem:[%s691_s0 + $0x60] sm:$0xff]  ;;  %v423_v9 = vld [vmem:[%s691_s0 + $0x68] sm:$0xff]  ;;  %v413_v14 = vld [vmem:[%s691_s0 + $0x18] sm:$0xff] }
   0x6   :  { %203 = vmatpush.bf16.msra.mxu0 %v426_v1  ;;  %431 = vmatpush.bf16.msra.mxu1 %v426_v1  ;;  %v417_v15 = vld [vmem:[%s691_s0 + $0x38] sm:$0xff]  ;;  %v528_v18 = vld [vmem:[%s692_s2] ss:$0 sm:$0xff] }
   0x7   :  { %432 = vmatpush.bf16.msra.mxu2 %v426_v1  ;;  %433 = vmatpush.bf16.msra.mxu3 %v426_v1  ;;  %v421_v16 = vld [vmem:[%s691_s0 + $0x58] sm:$0xff] }
   0x8   :  { %v425_v17 = vld [vmem:[%s691_s0 + $0x78] sm:$0xff] }
   0x9   :  { %394 = vmatmul.msk.bf16.vlgmr.msra.gmra.mxu0 %vm147_vm0, %v410_v2  ;;  %398 = vmatmul.msk.bf16.vlgmr.msra.gmra.mxu1 %vm147_vm0, %v414_v3 }
   0xa   :  { %402 = vmatmul.msk.bf16.vlgmr.msra.gmra.mxu2 %vm147_vm0, %v418_v4  ;;  %406 = vmatmul.msk.bf16.vlgmr.msra.gmra.mxu3 %vm147_vm0, %v422_v5 }
  0x19   :  { %395 = vmatmul.msk.bf16.gmra.mxu0 %vm147_vm0, %v411_v6  ;;  %399 = vmatmul.msk.bf16.gmra.mxu1 %vm147_vm0, %v415_v7 }
  0x1a   :  { %403 = vmatmul.msk.bf16.gmra.mxu2 %vm147_vm0, %v419_v8  ;;  %407 = vmatmul.msk.bf16.gmra.mxu3 %vm147_vm0, %v423_v9 }
  0x29   :  { %396 = vmatmul.msk.bf16.gmra.mxu0 %vm147_vm0, %v412_v10  ;;  %400 = vmatmul.msk.bf16.gmra.mxu1 %vm147_vm0, %v416_v11 }
  0x2a   :  { %404 = vmatmul.msk.bf16.gmra.mxu2 %vm147_vm0, %v420_v12  ;;  %408 = vmatmul.msk.bf16.gmra.mxu3 %vm147_vm0, %v424_v13 }
  0x39   :  { %397 = vmatmul.msk.bf16.gmra.mxu0 %vm147_vm0, %v413_v14  ;;  %401 = vmatmul.msk.bf16.gmra.mxu1 %vm147_vm0, %v417_v15 }
  0x3a   :  { %405 = vmatmul.msk.bf16.gmra.mxu2 %vm147_vm0, %v421_v16  ;;  %409 = vmatmul.msk.bf16.gmra.mxu3 %vm147_vm0, %v425_v17 }
  0x86   :  { %v205_v19 = vpop.f32.mrf.mxu0  ;;  %v225_v20 = vpop.f32.mrf.mxu1 }
  0x87   :  { %v206_v21 = vadd.f32 %v528_v18, %v205_v19  ;;  %v226_v22 = vadd.f32 %v528_v18, %v225_v20 }
  0x89   :  { %286 = vst.msk [vmem:[%s693_s3] sm:$0xff] %vm285_vm1, %v206_v21 }
  0x8a   :  { %294 = vst.msk [vmem:[%s693_s3 + $0x40] sm:$0xff] %vm285_vm1, %v226_v22 }
  0x8d   :  { %v245_v23 = vpop.f32.mrf.mxu2  ;;  %v265_v24 = vpop.f32.mrf.mxu3 }
  0x8e   :  { %v246_v25 = vadd.f32 %v528_v18, %v245_v23  ;;  %v266_v26 = vadd.f32 %v528_v18, %v265_v24  ;;  %v207_v27 = vpop.f32.mrf.mxu0  ;;  %v227_v28 = vpop.f32.mrf.mxu1 }
  0x8f   :  { %v208_v29 = vadd.f32 %v528_v18, %v207_v27  ;;  %v228_v30 = vadd.f32 %v528_v18, %v227_v28 }
  0x90   :  { %302 = vst.msk [vmem:[%s693_s3 + $0x80] sm:$0xff] %vm285_vm1, %v246_v25 }
  0x91   :  { %310 = vst.msk [vmem:[%s693_s3 + $0xc0] sm:$0xff] %vm285_vm1, %v266_v26 }
  0x92   :  { %287 = vst.msk [vmem:[%s693_s3 + $0x8] sm:$0xff] %vm285_vm1, %v208_v29 }
  0x93   :  { %295 = vst.msk [vmem:[%s693_s3 + $0x48] sm:$0xff] %vm285_vm1, %v228_v30 }
  0x95   :  { %v247_v31 = vpop.f32.mrf.mxu2  ;;  %v267_v32 = vpop.f32.mrf.mxu3 }
  0x96   :  { %v248_v33 = vadd.f32 %v528_v18, %v247_v31  ;;  %v268_v34 = vadd.f32 %v528_v18, %v267_v32  ;;  %v210_v35 = vpop.f32.mrf.mxu0  ;;  %v230_v36 = vpop.f32.mrf.mxu1 }
  0x97   :  { %v211_v37 = vadd.f32 %v528_v18, %v210_v35  ;;  %v231_v38 = vadd.f32 %v528_v18, %v230_v36 }
  0x98   :  { %303 = vst.msk [vmem:[%s693_s3 + $0x88] sm:$0xff] %vm285_vm1, %v248_v33 }
  0x99   :  { %311 = vst.msk [vmem:[%s693_s3 + $0xc8] sm:$0xff] %vm285_vm1, %v268_v34 }
  0x9a   :  { %288 = vst.msk [vmem:[%s693_s3 + $0x10] sm:$0xff] %vm285_vm1, %v211_v37 }
  0x9b   :  { %296 = vst.msk [vmem:[%s693_s3 + $0x50] sm:$0xff] %vm285_vm1, %v231_v38 }
  0x9d   :  { %v250_v39 = vpop.f32.mrf.mxu2  ;;  %v270_v40 = vpop.f32.mrf.mxu3 }
  0x9e   :  { %v251_v41 = vadd.f32 %v528_v18, %v250_v39  ;;  %v271_v42 = vadd.f32 %v528_v18, %v270_v40  ;;  %v212_v43 = vpop.f32.mrf.mxu0  ;;  %v232_v44 = vpop.f32.mrf.mxu1 }
  0x9f   :  { %v213_v45 = vadd.f32 %v528_v18, %v212_v43  ;;  %v233_v46 = vadd.f32 %v528_v18, %v232_v44 }
  0xa0   :  { %304 = vst.msk [vmem:[%s693_s3 + $0x90] sm:$0xff] %vm285_vm1, %v251_v41 }
  0xa1   :  { %312 = vst.msk [vmem:[%s693_s3 + $0xd0] sm:$0xff] %vm285_vm1, %v271_v42 }
  0xa2   :  { %289 = vst.msk [vmem:[%s693_s3 + $0x18] sm:$0xff] %vm285_vm1, %v213_v45 }
  0xa3   :  { %297 = vst.msk [vmem:[%s693_s3 + $0x58] sm:$0xff] %vm285_vm1, %v233_v46 }
  0xa5   :  { %v252_v47 = vpop.f32.mrf.mxu2  ;;  %v272_v48 = vpop.f32.mrf.mxu3 }
  0xa6   :  { %v253_v49 = vadd.f32 %v528_v18, %v252_v47  ;;  %v273_v50 = vadd.f32 %v528_v18, %v272_v48  ;;  %v215_v51 = vpop.f32.mrf.mxu0  ;;  %v235_v52 = vpop.f32.mrf.mxu1 }
  0xa7   :  { %v216_v53 = vadd.f32 %v528_v18, %v215_v51  ;;  %v236_v54 = vadd.f32 %v528_v18, %v235_v52 }
  0xa8   :  { %305 = vst.msk [vmem:[%s693_s3 + $0x98] sm:$0xff] %vm285_vm1, %v253_v49 }
  0xa9   :  { %313 = vst.msk [vmem:[%s693_s3 + $0xd8] sm:$0xff] %vm285_vm1, %v273_v50 }
  0xaa   :  { %290 = vst.msk [vmem:[%s693_s3 + $0x20] sm:$0xff] %vm285_vm1, %v216_v53 }
  0xab   :  { %298 = vst.msk [vmem:[%s693_s3 + $0x60] sm:$0xff] %vm285_vm1, %v236_v54 }
  0xad   :  { %v255_v55 = vpop.f32.mrf.mxu2  ;;  %v275_v56 = vpop.f32.mrf.mxu3 }
  0xae   :  { %v256_v57 = vadd.f32 %v528_v18, %v255_v55  ;;  %v276_v58 = vadd.f32 %v528_v18, %v275_v56  ;;  %v217_v59 = vpop.f32.mrf.mxu0  ;;  %v237_v60 = vpop.f32.mrf.mxu1 }
  0xaf   :  { %v218_v61 = vadd.f32 %v528_v18, %v217_v59  ;;  %v238_v62 = vadd.f32 %v528_v18, %v237_v60 }
  0xb0   :  { %306 = vst.msk [vmem:[%s693_s3 + $0xa0] sm:$0xff] %vm285_vm1, %v256_v57 }
  0xb1   :  { %314 = vst.msk [vmem:[%s693_s3 + $0xe0] sm:$0xff] %vm285_vm1, %v276_v58 }
  0xb2   :  { %291 = vst.msk [vmem:[%s693_s3 + $0x28] sm:$0xff] %vm285_vm1, %v218_v61 }
  0xb3   :  { %299 = vst.msk [vmem:[%s693_s3 + $0x68] sm:$0xff] %vm285_vm1, %v238_v62 }
  0xb5   :  { %v257_v63 = vpop.f32.mrf.mxu2  ;;  %v277_v0 = vpop.f32.mrf.mxu3 }
  0xb6   :  { %v258_v1 = vadd.f32 %v528_v18, %v257_v63  ;;  %v278_v2 = vadd.f32 %v528_v18, %v277_v0  ;;  %v220_v3 = vpop.f32.mrf.mxu0  ;;  %v240_v4 = vpop.f32.mrf.mxu1 }
  0xb7   :  { %v221_v5 = vadd.f32 %v528_v18, %v220_v3  ;;  %v241_v6 = vadd.f32 %v528_v18, %v240_v4 }
  0xb8   :  { %307 = vst.msk [vmem:[%s693_s3 + $0xa8] sm:$0xff] %vm285_vm1, %v258_v1 }
  0xb9   :  { %315 = vst.msk [vmem:[%s693_s3 + $0xe8] sm:$0xff] %vm285_vm1, %v278_v2 }
  0xba   :  { %292 = vst.msk [vmem:[%s693_s3 + $0x30] sm:$0xff] %vm285_vm1, %v221_v5 }
  0xbb   :  { %300 = vst.msk [vmem:[%s693_s3 + $0x70] sm:$0xff] %vm285_vm1, %v241_v6 }
  0xbd   :  { %v260_v7 = vpop.f32.mrf.mxu2  ;;  %v280_v8 = vpop.f32.mrf.mxu3 }
  0xbe   :  { %v261_v9 = vadd.f32 %v528_v18, %v260_v7  ;;  %v281_v10 = vadd.f32 %v528_v18, %v280_v8  ;;  %v222_v11 = vpop.f32.mrf.mxu0  ;;  %v242_v12 = vpop.f32.mrf.mxu1 }
  0xbf   :  { %v223_v13 = vadd.f32 %v528_v18, %v222_v11  ;;  %v243_v14 = vadd.f32 %v528_v18, %v242_v12 }
  0xc0   :  { %308 = vst.msk [vmem:[%s693_s3 + $0xb0] sm:$0xff] %vm285_vm1, %v261_v9 }
  0xc1   :  { %316 = vst.msk [vmem:[%s693_s3 + $0xf0] sm:$0xff] %vm285_vm1, %v281_v10 }
  0xc2   :  { %293 = vst.msk [vmem:[%s693_s3 + $0x38] sm:$0xff] %vm285_vm1, %v223_v13 }
  0xc3   :  { %301 = vst.msk [vmem:[%s693_s3 + $0x78] sm:$0xff] %vm285_vm1, %v243_v14 }
  0xc5   :  { %v262_v15 = vpop.f32.mrf.mxu2  ;;  %v282_v16 = vpop.f32.mrf.mxu3 }
  0xc6   :  { %v263_v17 = vadd.f32 %v528_v18, %v262_v15  ;;  %v283_v19 = vadd.f32 %v528_v18, %v282_v16 }
  0xc8   :  { %309 = vst.msk [vmem:[%s693_s3 + $0xb8] sm:$0xff] %vm285_vm1, %v263_v17 }
  0xc9   :  { %317 = vst.msk [vmem:[%s693_s3 + $0xf8] sm:$0xff] %vm285_vm1, %v283_v19 }

// kernel: _forward.4
= control target key start
LH: loop header
LB: loop body
LE: loop exit
PB: predicated region body
PF: predicated region fallthrough
CT: control target
= control target key end

     0   :  { %s483_s12 = smov 0   ;;  %s524_s0 = inlined_call_operand.vmem [shape: bf16[8,16,64], index: 0, kind: input, shape index: {}]   ;;  %s525_s1 = inlined_call_operand.vmem [shape: bf16[8,16,64], index: 1, kind: input, shape index: {}]   ;;  %s526_s2 = inlined_call_operand.vmem [shape: bf16[8,16,64], index: 2, kind: input, shape index: {}]   ;;  %s527_s3 = inlined_call_operand.vmem [shape: f32[8,16,64], index: 3, kind: output, shape index: {}]  }
   0x1 LB: > { %s403_s13 = sadd.s32 4294967295, %s461_s12   ;;  %p407_p0 = scmp.ge.s32.totalorder %s461_s12, 1  ;;  %s461_s12 = sphi %s483_s12, %s13_s12  }
   0x2   : > { %p157_p1 = scmp.lt.s32.totalorder %s461_s12, 9 }
   0x4   : > { %p158_p2 = pnand %p407_p0, %p157_p1 }
   0x5   : > { %p191_p3 = scmp.lt.s32.totalorder (!%p158_p2), %s403_s13, 7 }
   0x6   : > { %161 = sbr.rel (%p158_p2) target bundleno = 558 (0x22e), region = 32 }
   0xb   : > { %s529_s13 = smov (!%p191_p3, %s403_s13), 7  ;;  %vm226_vm0 = vcmask 523264   ;;  %vm247_vm1 = vcmask 130048  }
   0xc   : > { %s494_s14 = sshll.u32 %s529_s13, 3  ;;  %s435_s24 = sshll.u32 %s529_s13, 4 }
   0xd   : > { %s200_s17 = scalar_lea.vmem %s525_s1, %s494_s14  ;;  %s195_s20 = scalar_lea.vmem %s524_s0, %s494_s14 }
   0xe   : > { %v437_v0 = vld [vmem:[%s200_s17] sm:$0xff]  ;;  %s205_s23 = scalar_lea.vmem %s526_s2, %s494_s14  ;;  %s210_s27 = scalar_lea.vmem %s527_s3, %s435_s24 }
   0xf   : > { %v231_v1 = vsel %vm226_vm0, %v437_v0, 0  ;;  %v436_v2 = vld [vmem:[%s195_s20] sm:$0xff] }
  0x10   : > { %240 = vmatpush.bf16.xpose.msra.mxu0 %v231_v1  ;;  %v438_v17 = vld [vmem:[%s205_s23] sm:$0xff] }
  0x11   : > { %315 = vmatpush.bf16.msra.mxu1 %v438_v17 }
  0x17   : > { %424 = vmatmul.msk.bf16.vlgmr.msra.gmra.mxu0 %vm226_vm0, %v436_v2 }
  0x94   : > { %v242_v3 = vpop.f32.mrf.mxu0 }
  0x95   : > { %v248_v4 = vsel %vm247_vm1, %v242_v3, -inf }
  0x96   : > { %249 = vmax.xlane.f32.xlu0 %v248_v4 }
  0x9c   : > { %v244_v5 = vpop.f32.mrf.mxu0 }
  0x9d   : > { %v251_v6 = vsel %vm247_vm1, %v244_v5, -inf }
  0x9e   : > { %252 = vmax.xlane.f32.xlu0 %v251_v6 }
 0x109   : > { %v250_v7 = vpop.xlane.xlu0 %249 }
 0x10a   : > { %v254_v8 = vsub.f32 %v242_v3, %v250_v7 }
 0x10c   : > { %v256_v9 = vmul.f32 1.442695, %v254_v8 }
 0x10e   : > { %447 = vpow2.f32 %v256_v9 }
 0x111   : > { %v253_v10 = vpop.xlane.xlu0 %252 }
 0x112   : > { %v255_v11 = vsub.f32 %v244_v5, %v253_v10 }
 0x114   : > { %v448_v12 = vpop.eup %447  ;;  %v258_v13 = vmul.f32 1.442695, %v255_v11 }
 0x115   : > { %v260_v14 = vsel %vm247_vm1, %v448_v12, 0.0 }
 0x116   : > { %449 = vpow2.f32 %v258_v13  ;;  %261 = vadd.xlane.f32.xlu1 %v260_v14 }
 0x11c   : > { %v450_v15 = vpop.eup %449 }
 0x11d   : > { %v263_v16 = vsel %vm247_vm1, %v450_v15, 0.0 }
 0x11e   : > { %264 = vadd.xlane.f32.xlu1 %v263_v16 }
 0x189   : > { %v262_v18 = vpop.xlane.xlu1 %261 }
 0x18a   : > { %451 = vrcp.f32 %v262_v18  ;;  %v277_v27 = vand.u32 2147483648, %v262_v18  ;;  %vm271_vm3 = vweird.f32 %v262_v18  ;;  %v275_v28 = vand.u32 2147483647, %v262_v18 }
 0x18c   : > { %v278_v34 = vor.u32 1.1754944e-38, %v277_v27  ;;  %vm276_vm6 = vcmp.eq.f32.partialorder %v275_v28, 8.507059e+37 }
 0x190   : > { %v452_v19 = vpop.eup %451 }
 0x191   : > { %v267_v20 = vmul.f32 %v452_v19, %v262_v18  ;;  %v265_v21 = vpop.xlane.xlu1 %264  ;;  %vm272_vm2 = vweird.f32 %v452_v19 }
 0x192   : > { %453 = vrcp.f32 %v265_v21  ;;  %vm273_vm4 = vmor %vm271_vm3, %vm272_vm2  ;;  %v292_v30 = vand.u32 2147483648, %v265_v21  ;;  %v290_v32 = vand.u32 2147483647, %v265_v21  ;;  %vm286_vm7 = vweird.f32 %v265_v21 }
 0x193   : > { %v268_v22 = vsub.f32 1.0, %v267_v20 }
 0x194   : > { %v293_v36 = vor.u32 1.1754944e-38, %v292_v30  ;;  %vm291_vm9 = vcmp.eq.f32.partialorder %v290_v32, 8.507059e+37 }
 0x195   : > { %v269_v23 = vmul.f32 %v452_v19, %v268_v22 }
 0x197   : > { %v270_v25 = vadd.f32 %v452_v19, %v269_v23 }
 0x198   : > { %v454_v24 = vpop.eup %453 }
 0x199   : > { %v282_v26 = vmul.f32 %v454_v24, %v265_v21  ;;  %vm287_vm5 = vweird.f32 %v454_v24  ;;  %v274_v33 = vsel %vm273_vm4, %v452_v19, %v270_v25 }
 0x19a   : > { %vm288_vm8 = vmor %vm286_vm7, %vm287_vm5  ;;  %v279_v37 = vsel %vm276_vm6, %v278_v34, %v274_v33 }
 0x19b   : > { %v283_v29 = vsub.f32 1.0, %v282_v26  ;;  %v280_v40 = vmul.f32 %v448_v12, %v279_v37 }
 0x19d   : > { %v284_v31 = vmul.f32 %v454_v24, %v283_v29 }
 0x19f   : > { %v285_v35 = vadd.f32 %v454_v24, %v284_v31 }
 0x1a1   : > { %v289_v38 = vsel %vm288_vm8, %v454_v24, %v285_v35 }
 0x1a2   : > { %v294_v39 = vsel %vm291_vm9, %v293_v36, %v289_v38 }
 0x1a3   : > { %v295_v41 = vmul.f32 %v450_v15, %v294_v39 }
 0x1a5   : > { %v296_v42 = vpack.c.bf16 %v295_v41, %v280_v40 }
 0x1a7   : > { %429 = vmatmul.msk.bf16.vlgmr.msra.gmra.mxu1 %vm247_vm1, %v296_v42 }
 0x224   : > { %v317_v43 = vpop.f32.mrf.mxu1 }
 0x225   : > { %322 = vst.msk [vmem:[%s210_s27] sm:$0xff] %vm226_vm0, %v317_v43 }
 0x22c   : > { %v319_v44 = vpop.f32.mrf.mxu1 }
 0x22d   : > { %323 = vst.msk [vmem:[%s210_s27 + $0x8] sm:$0xff] %vm226_vm0, %v319_v44 }
 0x22e PF: > { %s13_s12 = sadd.s32 1, %s461_s12  }
 0x22f   : > { %p10_p4 = scmp.ge.s32.totalorder %s13_s12, 10  }
 0x231   :  { %12 = sbr.rel (!%p10_p4) target bundleno = 1 (0x1), region = 68 }

// kernel: _forward.5
= control target key start
LH: loop header
LB: loop body
LE: loop exit
PB: predicated region body
PF: predicated region fallthrough
CT: control target
= control target key end

     0   :  { %vm147_vm0 = vcmask 261120   ;;  %s689_s1 = inlined_call_operand.vmem [shape: bf16[32,32], index: 1, kind: input, shape index: {}]   ;;  %s690_s0 = inlined_call_operand.vmem [shape: bf16[256,32], index: 0, kind: input, shape index: {}]   ;;  %s691_s2 = inlined_call_operand.vmem [shape: f32[1,32], index: 2, kind: input, shape index: {}]   ;;  %s692_s3 = inlined_call_operand.vmem [shape: f32[256,32], index: 3, kind: output, shape index: {}]  }
   0x1   :  { %v426_v0 = vld [vmem:[%s689_s1 + $0x8] sm:$0xff]  ;;  %v425_v1 = vld [vmem:[%s689_s1] sm:$0xff]  ;;  %v411_v10 = vld [vmem:[%s690_s0 + $0x10] sm:$0xff] }
   0x2   :  { %202 = vmatpush.bf16.msra.mxu0 %v426_v0  ;;  %427 = vmatpush.bf16.msra.mxu1 %v426_v0  ;;  %v409_v2 = vld [vmem:[%s690_s0] sm:$0xff]  ;;  %v410_v6 = vld [vmem:[%s690_s0 + $0x8] sm:$0xff]  ;;  %v415_v11 = vld [vmem:[%s690_s0 + $0x30] sm:$0xff] }
   0x3   :  { %428 = vmatpush.bf16.msra.mxu2 %v426_v0  ;;  %429 = vmatpush.bf16.msra.mxu3 %v426_v0  ;;  %v413_v3 = vld [vmem:[%s690_s0 + $0x20] sm:$0xff]  ;;  %v414_v7 = vld [vmem:[%s690_s0 + $0x28] sm:$0xff]  ;;  %v419_v12 = vld [vmem:[%s690_s0 + $0x50] sm:$0xff] }
   0x4   :  { %v417_v4 = vld [vmem:[%s690_s0 + $0x40] sm:$0xff]  ;;  %v418_v8 = vld [vmem:[%s690_s0 + $0x48] sm:$0xff]  ;;  %v423_v13 = vld [vmem:[%s690_s0 + $0x70] sm:$0xff] }
   0x5   :  { %v421_v5 = vld [vmem:[%s690_s0 + $0x60] sm:$0xff]  ;;  %v422_v9 = vld [vmem:[%s690_s0 + $0x68] sm:$0xff]  ;;  %v412_v14 = vld [vmem:[%s690_s0 + $0x18] sm:$0xff] }
   0x6   :  { %203 = vmatpush.bf16.msra.mxu0 %v425_v1  ;;  %430 = vmatpush.bf16.msra.mxu1 %v425_v1  ;;  %v416_v15 = vld [vmem:[%s690_s0 + $0x38] sm:$0xff]  ;;  %v527_v18 = vld [vmem:[%s691_s2] ss:$0 sm:$0xff] }
   0x7   :  { %431 = vmatpush.bf16.msra.mxu2 %v425_v1  ;;  %432 = vmatpush.bf16.msra.mxu3 %v425_v1  ;;  %v420_v16 = vld [vmem:[%s690_s0 + $0x58] sm:$0xff] }
   0x8   :  { %v424_v17 = vld [vmem:[%s690_s0 + $0x78] sm:$0xff] }
   0x9   :  { %393 = vmatmul.msk.bf16.vlgmr.msra.gmra.mxu0 %vm147_vm0, %v409_v2  ;;  %397 = vmatmul.msk.bf16.vlgmr.msra.gmra.mxu1 %vm147_vm0, %v413_v3 }
   0xa   :  { %401 = vmatmul.msk.bf16.vlgmr.msra.gmra.mxu2 %vm147_vm0, %v417_v4  ;;  %405 = vmatmul.msk.bf16.vlgmr.msra.gmra.mxu3 %vm147_vm0, %v421_v5 }
  0x19   :  { %394 = vmatmul.msk.bf16.gmra.mxu0 %vm147_vm0, %v410_v6  ;;  %398 = vmatmul.msk.bf16.gmra.mxu1 %vm147_vm0, %v414_v7 }
  0x1a   :  { %402 = vmatmul.msk.bf16.gmra.mxu2 %vm147_vm0, %v418_v8  ;;  %406 = vmatmul.msk.bf16.gmra.mxu3 %vm147_vm0, %v422_v9 }
  0x29   :  { %395 = vmatmul.msk.bf16.gmra.mxu0 %vm147_vm0, %v411_v10  ;;  %399 = vmatmul.msk.bf16.gmra.mxu1 %vm147_vm0, %v415_v11 }
  0x2a   :  { %403 = vmatmul.msk.bf16.gmra.mxu2 %vm147_vm0, %v419_v12  ;;  %407 = vmatmul.msk.bf16.gmra.mxu3 %vm147_vm0, %v423_v13 }
  0x39   :  { %396 = vmatmul.msk.bf16.gmra.mxu0 %vm147_vm0, %v412_v14  ;;  %400 = vmatmul.msk.bf16.gmra.mxu1 %vm147_vm0, %v416_v15 }
  0x3a   :  { %404 = vmatmul.msk.bf16.gmra.mxu2 %vm147_vm0, %v420_v16  ;;  %408 = vmatmul.msk.bf16.gmra.mxu3 %vm147_vm0, %v424_v17 }
  0x86   :  { %v205_v19 = vpop.f32.mrf.mxu0  ;;  %v225_v20 = vpop.f32.mrf.mxu1 }
  0x87   :  { %v206_v21 = vadd.f32 %v527_v18, %v205_v19  ;;  %v226_v22 = vadd.f32 %v527_v18, %v225_v20 }
  0x89   :  { %285 = vst.msk [vmem:[%s692_s3] sm:$0xff] %vm147_vm0, %v206_v21 }
  0x8a   :  { %293 = vst.msk [vmem:[%s692_s3 + $0x40] sm:$0xff] %vm147_vm0, %v226_v22 }
  0x8d   :  { %v245_v23 = vpop.f32.mrf.mxu2  ;;  %v265_v24 = vpop.f32.mrf.mxu3 }
  0x8e   :  { %v246_v25 = vadd.f32 %v527_v18, %v245_v23  ;;  %v266_v26 = vadd.f32 %v527_v18, %v265_v24  ;;  %v207_v27 = vpop.f32.mrf.mxu0  ;;  %v227_v28 = vpop.f32.mrf.mxu1 }
  0x8f   :  { %v208_v29 = vadd.f32 %v527_v18, %v207_v27  ;;  %v228_v30 = vadd.f32 %v527_v18, %v227_v28 }
  0x90   :  { %301 = vst.msk [vmem:[%s692_s3 + $0x80] sm:$0xff] %vm147_vm0, %v246_v25 }
  0x91   :  { %309 = vst.msk [vmem:[%s692_s3 + $0xc0] sm:$0xff] %vm147_vm0, %v266_v26 }
  0x92   :  { %286 = vst.msk [vmem:[%s692_s3 + $0x8] sm:$0xff] %vm147_vm0, %v208_v29 }
  0x93   :  { %294 = vst.msk [vmem:[%s692_s3 + $0x48] sm:$0xff] %vm147_vm0, %v228_v30 }
  0x95   :  { %v247_v31 = vpop.f32.mrf.mxu2  ;;  %v267_v32 = vpop.f32.mrf.mxu3 }
  0x96   :  { %v248_v33 = vadd.f32 %v527_v18, %v247_v31  ;;  %v268_v34 = vadd.f32 %v527_v18, %v267_v32  ;;  %v210_v35 = vpop.f32.mrf.mxu0  ;;  %v230_v36 = vpop.f32.mrf.mxu1 }
  0x97   :  { %v211_v37 = vadd.f32 %v527_v18, %v210_v35  ;;  %v231_v38 = vadd.f32 %v527_v18, %v230_v36 }
  0x98   :  { %302 = vst.msk [vmem:[%s692_s3 + $0x88] sm:$0xff] %vm147_vm0, %v248_v33 }
  0x99   :  { %310 = vst.msk [vmem:[%s692_s3 + $0xc8] sm:$0xff] %vm147_vm0, %v268_v34 }
  0x9a   :  { %287 = vst.msk [vmem:[%s692_s3 + $0x10] sm:$0xff] %vm147_vm0, %v211_v37 }
  0x9b   :  { %295 = vst.msk [vmem:[%s692_s3 + $0x50] sm:$0xff] %vm147_vm0, %v231_v38 }
  0x9d   :  { %v250_v39 = vpop.f32.mrf.mxu2  ;;  %v270_v40 = vpop.f32.mrf.mxu3 }
  0x9e   :  { %v251_v41 = vadd.f32 %v527_v18, %v250_v39  ;;  %v271_v42 = vadd.f32 %v527_v18, %v270_v40  ;;  %v212_v43 = vpop.f32.mrf.mxu0  ;;  %v232_v44 = vpop.f32.mrf.mxu1 }
  0x9f   :  { %v213_v45 = vadd.f32 %v527_v18, %v212_v43  ;;  %v233_v46 = vadd.f32 %v527_v18, %v232_v44 }
  0xa0   :  { %303 = vst.msk [vmem:[%s692_s3 + $0x90] sm:$0xff] %vm147_vm0, %v251_v41 }
  0xa1   :  { %311 = vst.msk [vmem:[%s692_s3 + $0xd0] sm:$0xff] %vm147_vm0, %v271_v42 }
  0xa2   :  { %288 = vst.msk [vmem:[%s692_s3 + $0x18] sm:$0xff] %vm147_vm0, %v213_v45 }
  0xa3   :  { %296 = vst.msk [vmem:[%s692_s3 + $0x58] sm:$0xff] %vm147_vm0, %v233_v46 }
  0xa5   :  { %v252_v47 = vpop.f32.mrf.mxu2  ;;  %v272_v48 = vpop.f32.mrf.mxu3 }
  0xa6   :  { %v253_v49 = vadd.f32 %v527_v18, %v252_v47  ;;  %v273_v50 = vadd.f32 %v527_v18, %v272_v48  ;;  %v215_v51 = vpop.f32.mrf.mxu0  ;;  %v235_v52 = vpop.f32.mrf.mxu1 }
  0xa7   :  { %v216_v53 = vadd.f32 %v527_v18, %v215_v51  ;;  %v236_v54 = vadd.f32 %v527_v18, %v235_v52 }
  0xa8   :  { %304 = vst.msk [vmem:[%s692_s3 + $0x98] sm:$0xff] %vm147_vm0, %v253_v49 }
  0xa9   :  { %312 = vst.msk [vmem:[%s692_s3 + $0xd8] sm:$0xff] %vm147_vm0, %v273_v50 }
  0xaa   :  { %289 = vst.msk [vmem:[%s692_s3 + $0x20] sm:$0xff] %vm147_vm0, %v216_v53 }
  0xab   :  { %297 = vst.msk [vmem:[%s692_s3 + $0x60] sm:$0xff] %vm147_vm0, %v236_v54 }
  0xad   :  { %v255_v55 = vpop.f32.mrf.mxu2  ;;  %v275_v56 = vpop.f32.mrf.mxu3 }
  0xae   :  { %v256_v57 = vadd.f32 %v527_v18, %v255_v55  ;;  %v276_v58 = vadd.f32 %v527_v18, %v275_v56  ;;  %v217_v59 = vpop.f32.mrf.mxu0  ;;  %v237_v60 = vpop.f32.mrf.mxu1 }
  0xaf   :  { %v218_v61 = vadd.f32 %v527_v18, %v217_v59  ;;  %v238_v62 = vadd.f32 %v527_v18, %v237_v60 }
  0xb0   :  { %305 = vst.msk [vmem:[%s692_s3 + $0xa0] sm:$0xff] %vm147_vm0, %v256_v57 }
  0xb1   :  { %313 = vst.msk [vmem:[%s692_s3 + $0xe0] sm:$0xff] %vm147_vm0, %v276_v58 }
  0xb2   :  { %290 = vst.msk [vmem:[%s692_s3 + $0x28] sm:$0xff] %vm147_vm0, %v218_v61 }
  0xb3   :  { %298 = vst.msk [vmem:[%s692_s3 + $0x68] sm:$0xff] %vm147_vm0, %v238_v62 }
  0xb5   :  { %v257_v63 = vpop.f32.mrf.mxu2  ;;  %v277_v0 = vpop.f32.mrf.mxu3 }
  0xb6   :  { %v258_v1 = vadd.f32 %v527_v18, %v257_v63  ;;  %v278_v2 = vadd.f32 %v527_v18, %v277_v0  ;;  %v220_v3 = vpop.f32.mrf.mxu0  ;;  %v240_v4 = vpop.f32.mrf.mxu1 }
  0xb7   :  { %v221_v5 = vadd.f32 %v527_v18, %v220_v3  ;;  %v241_v6 = vadd.f32 %v527_v18, %v240_v4 }
  0xb8   :  { %306 = vst.msk [vmem:[%s692_s3 + $0xa8] sm:$0xff] %vm147_vm0, %v258_v1 }
  0xb9   :  { %314 = vst.msk [vmem:[%s692_s3 + $0xe8] sm:$0xff] %vm147_vm0, %v278_v2 }
  0xba   :  { %291 = vst.msk [vmem:[%s692_s3 + $0x30] sm:$0xff] %vm147_vm0, %v221_v5 }
  0xbb   :  { %299 = vst.msk [vmem:[%s692_s3 + $0x70] sm:$0xff] %vm147_vm0, %v241_v6 }
  0xbd   :  { %v260_v7 = vpop.f32.mrf.mxu2  ;;  %v280_v8 = vpop.f32.mrf.mxu3 }
  0xbe   :  { %v261_v9 = vadd.f32 %v527_v18, %v260_v7  ;;  %v281_v10 = vadd.f32 %v527_v18, %v280_v8  ;;  %v222_v11 = vpop.f32.mrf.mxu0  ;;  %v242_v12 = vpop.f32.mrf.mxu1 }
  0xbf   :  { %v223_v13 = vadd.f32 %v527_v18, %v222_v11  ;;  %v243_v14 = vadd.f32 %v527_v18, %v242_v12 }
  0xc0   :  { %307 = vst.msk [vmem:[%s692_s3 + $0xb0] sm:$0xff] %vm147_vm0, %v261_v9 }
  0xc1   :  { %315 = vst.msk [vmem:[%s692_s3 + $0xf0] sm:$0xff] %vm147_vm0, %v281_v10 }
  0xc2   :  { %292 = vst.msk [vmem:[%s692_s3 + $0x38] sm:$0xff] %vm147_vm0, %v223_v13 }
  0xc3   :  { %300 = vst.msk [vmem:[%s692_s3 + $0x78] sm:$0xff] %vm147_vm0, %v243_v14 }
  0xc5   :  { %v262_v15 = vpop.f32.mrf.mxu2  ;;  %v282_v16 = vpop.f32.mrf.mxu3 }
  0xc6   :  { %v263_v17 = vadd.f32 %v527_v18, %v262_v15  ;;  %v283_v19 = vadd.f32 %v527_v18, %v282_v16 }
  0xc8   :  { %308 = vst.msk [vmem:[%s692_s3 + $0xb8] sm:$0xff] %vm147_vm0, %v263_v17 }
  0xc9   :  { %316 = vst.msk [vmem:[%s692_s3 + $0xf8] sm:$0xff] %vm147_vm0, %v283_v19 }

</bundles_post_ra>
